<compile_context>
chip_gen: v6e
topology: v6e:2x2x1
jax: 0.10.0
libtpu: 0.0.40
codegen_flags: <defaults>
</compile_context>

<pallas_src>
import functools
import math

import jax
import jax.numpy as jnp
from jax.experimental import pallas as pl
from jax.experimental.pallas import tpu as pltpu

EPS = 1e-6
NEG_INF = -1e9
VMEM_LIMIT = 64 * 1024 * 1024          # explicit scoped-VMEM budget (all gens)
ROW_CAP = 256                          # FFN row tile / attention query tile cap


# ----------------------------- in-kernel helpers -----------------------------

def _layer_norm_f32(x, g, b):
    # Annotated-transformer LayerNorm: g * (x - mean) / (std + eps) + b,
    # torch `x.std(-1)` is the UNBIASED std (ddof = 1). Exact division (no
    # approximate reciprocal) per the correctness review.
    d = x.shape[-1]
    mean = jnp.mean(x, axis=-1, keepdims=True)
    diff = x - mean
    var = jnp.sum(diff * diff, axis=-1, keepdims=True) * (1.0 / (d - 1))
    return g * (diff / (jnp.sqrt(var) + EPS)) + b


def _attn_body(x_ref, key_ref, mask_ref, g_ref, be_ref, wq_ref, bq_ref,
               wkv_ref, bkv_ref, wo_ref, bo_ref, o_ref, ctx_ref, h, scale):
    # One (batch, query-tile) per grid step; all heads processed in this step.
    x = x_ref[0].astype(jnp.float32)          # (tq, D) residual, f32 math
    k_in = key_ref[0]                         # (Sk, D) bf16 (straight to MXU)
    d_model = x.shape[-1]
    dk = d_model // h

    # sublayer pre-norm (query side only; key/value use the raw `key` tensor —
    # cross-attention, as in the original EncoderLayer)
    xn = _layer_norm_f32(x, g_ref[...], be_ref[...])

    # big fused projections (bf16 MXU inputs, f32 accumulation, full-K / full-N)
    q = jnp.dot(xn.astype(jnp.bfloat16), wq_ref[...],
                preferred_element_type=jnp.float32) + bq_ref[...]
    kv = jnp.dot(k_in, wkv_ref[...],
                 preferred_element_type=jnp.float32) + bkv_ref[...]

    q16 = q.astype(jnp.bfloat16)
    k16 = kv[:, :d_model].astype(jnp.bfloat16)
    v16 = kv[:, d_model:].astype(jnp.bfloat16)

    if mask_ref is not None:
        # int8 mask -> boolean keep-map, built ONCE per grid step (not per head)
        keep = mask_ref[0].astype(jnp.float32) > 0.0        # (tq, Sk)

    for head in range(h):                     # static unrolled loop over heads
        lo = head * dk
        hi = lo + dk
        s = jax.lax.dot_general(q16[:, lo:hi], k16[:, lo:hi],
                                (((1,), (1,)), ((), ())),
                                preferred_element_type=jnp.float32) * scale
        if mask_ref is not None:
            s = jnp.where(keep, s, NEG_INF)   # masked_fill(mask == 0, -1e9)
        m = jnp.max(s, axis=-1, keepdims=True)
        p = jnp.exp(s - m)                    # un-normalized probs, f32
        denom = jnp.sum(p, axis=-1, keepdims=True)           # (tq, 1)
        ctx_h = jnp.dot(p.astype(jnp.bfloat16), v16[:, lo:hi],
                        preferred_element_type=jnp.float32)  # (tq, dk)
        # deferred softmax normalization: (tq, dk) multiply instead of (tq, Sk);
        # per-head ctx written into VMEM scratch -> no lane-axis concat.
        ctx_ref[:, lo:hi] = ctx_h * pl.reciprocal(denom, approx=True)

    # output projection (full K = D) + residual, fused
    out = jnp.dot(ctx_ref[...].astype(jnp.bfloat16), wo_ref[...],
                  preferred_element_type=jnp.float32) + bo_ref[...] + x
    o_ref[0] = out.astype(o_ref.dtype)


def _attn_kernel_masked(x_ref, key_ref, mask_ref, g_ref, be_ref, wq_ref, bq_ref,
                        wkv_ref, bkv_ref, wo_ref, bo_ref, o_ref, ctx_ref,
                        *, h, scale):
    _attn_body(x_ref, key_ref, mask_ref, g_ref, be_ref, wq_ref, bq_ref,
               wkv_ref, bkv_ref, wo_ref, bo_ref, o_ref, ctx_ref, h, scale)


def _attn_kernel_nomask(x_ref, key_ref, g_ref, be_ref, wq_ref, bq_ref,
                        wkv_ref, bkv_ref, wo_ref, bo_ref, o_ref, ctx_ref,
                        *, h, scale):
    _attn_body(x_ref, key_ref, None, g_ref, be_ref, wq_ref, bq_ref,
               wkv_ref, bkv_ref, wo_ref, bo_ref, o_ref, ctx_ref, h, scale)


def _ffn_body(x_ref, g_ref, be_ref, w1_ref, b1_ref, w2_ref, b2_ref, o_ref,
              fg_ref=None, fb_ref=None):
    # LN2 + W1 + ReLU + W2 + residual (+ optional fused final LayerNorm).
    x = x_ref[...].astype(jnp.float32)                        # (tm, D)
    xn = _layer_norm_f32(x, g_ref[...], be_ref[...])
    hid = jnp.dot(xn.astype(jnp.bfloat16), w1_ref[...],
                  preferred_element_type=jnp.float32) + b1_ref[...]
    hid = jnp.maximum(hid, 0.0)
    y = jnp.dot(hid.astype(jnp.bfloat16), w2_ref[...],
                preferred_element_type=jnp.float32) + b2_ref[...] + x
    if fg_ref is not None:                                    # encoder-final LN
        y = _layer_norm_f32(y, fg_ref[...], fb_ref[...])
    o_ref[...] = y.astype(o_ref.dtype)


def _ffn_kernel(x_ref, g_ref, be_ref, w1_ref, b1_ref, w2_ref, b2_ref, o_ref):
    _ffn_body(x_ref, g_ref, be_ref, w1_ref, b1_ref, w2_ref, b2_ref, o_ref)


def _ffn_final_kernel(x_ref, g_ref, be_ref, w1_ref, b1_ref, w2_ref, b2_ref,
                      fg_ref, fb_ref, o_ref):
    _ffn_body(x_ref, g_ref, be_ref, w1_ref, b1_ref, w2_ref, b2_ref, o_ref,
              fg_ref, fb_ref)


def _ln_kernel(x_ref, g_ref, b_ref, o_ref):
    o_ref[...] = _layer_norm_f32(x_ref[...].astype(jnp.float32),
                                 g_ref[...], b_ref[...]).astype(o_ref.dtype)


# ----------------------------- tiling helpers -----------------------------

def _resident_spec(shape):
    # Constant block index across the whole grid -> resident in VMEM, and
    # single-buffered (no pointless double-buffering of weights).
    nd = len(shape)
    return pl.BlockSpec(shape, lambda *_: (0,) * nd,
                        pipeline_mode=pl.Buffered(1))


def _row_tiling(m, cap):
    """Return (tile, padded_rows): largest divisor of m <= cap that is a
    multiple of 8; otherwise pad m up to a multiple of cap."""
    if m <= cap:
        return m, m
    t = cap - (cap % 8)
    while t >= 8:
        if m % t == 0:
            return t, m
        t -= 8
    t = cap - (cap % 8)
    return t, ((m + t - 1) // t) * t


def _q_tiling(sq, cap):
    if sq <= cap:
        return sq
    t = cap - (cap % 8)
    while t >= 8:
        if sq % t == 0:
            return t
        t -= 8
    return sq   # TODO(synk): pad ragged long query sequences instead of one big tile


# ----------------------------- kernel wrappers -----------------------------

def attn_sublayer(x, key, mask_i8, lp, h):
    # x: (B, Sq, D) bf16 residual stream; key: (B, Sk, D) bf16; mask_i8: int8 or None
    B, Sq, D = x.shape
    Sk = key.shape[1]
    tq = _q_tiling(Sq, ROW_CAP)
    nq = Sq // tq
    scale = 1.0 / math.sqrt(D // h)

    in_specs = [
        pl.BlockSpec((1, tq, D), lambda b, q: (b, q, 0)),     # query / residual
        pl.BlockSpec((1, Sk, D), lambda b, q: (b, 0, 0)),     # key (bf16)
    ]
    args = [x, key]
    if mask_i8 is not None:
        in_specs.append(pl.BlockSpec((1, tq, Sk), lambda b, q: (b, q, 0)))
        args.append(mask_i8)
        kern = functools.partial(_attn_kernel_masked, h=h, scale=scale)
    else:
        kern = functools.partial(_attn_kernel_nomask, h=h, scale=scale)

    in_specs += [
        _resident_spec((1, D)),        # ln1 gamma
        _resident_spec((1, D)),        # ln1 beta
        _resident_spec((D, D)),        # Wq  (bf16)
        _resident_spec((1, D)),        # bq
        _resident_spec((D, 2 * D)),    # Wk|Wv (bf16, pre-concatenated)
        _resident_spec((1, 2 * D)),    # bk|bv
        _resident_spec((D, D)),        # Wo  (bf16)
        _resident_spec((1, D)),        # bo
    ]
    args += [lp["ln1_g"], lp["ln1_b"], lp["wq"], lp["bq"],
             lp["wkv"], lp["bkv"], lp["wo"], lp["bo"]]

    return pl.pallas_call(
        kern,
        out_shape=jax.ShapeDtypeStruct((B, Sq, D), x.dtype),
        grid=(B, nq),
        in_specs=in_specs,
        out_specs=pl.BlockSpec((1, tq, D), lambda b, q: (b, q, 0)),
        scratch_shapes=[pltpu.VMEM((tq, D), jnp.float32)],    # per-head ctx slab
        compiler_params=pltpu.CompilerParams(
            dimension_semantics=("parallel", "parallel"),
            vmem_limit_bytes=VMEM_LIMIT),
    )(*args)


def ffn_sublayer(x, lp, final_norm=None, out_dtype=None):
    B, S, D = x.shape
    M = B * S
    out_dtype = x.dtype if out_dtype is None else out_dtype
    d_ff = lp["w1"].shape[1]
    tm, Mp = _row_tiling(M, ROW_CAP)
    xf = x.reshape(M, D)
    if Mp != M:
        xf = jnp.pad(xf, ((0, Mp - M), (0, 0)))

    in_specs = [
        pl.BlockSpec((tm, D), lambda i: (i, 0)),              # row tile
        _resident_spec((1, D)), _resident_spec((1, D)),       # ln2 gamma / beta
        _resident_spec((D, d_ff)), _resident_spec((1, d_ff)), # W1 / b1
        _resident_spec((d_ff, D)), _resident_spec((1, D)),    # W2 / b2
    ]
    args = [xf, lp["ln2_g"], lp["ln2_b"], lp["w1"], lp["b1"], lp["w2"], lp["b2"]]
    if final_norm is not None:
        kern = _ffn_final_kernel
        in_specs += [_resident_spec((1, D)), _resident_spec((1, D))]
        args += [final_norm[0], final_norm[1]]
    else:
        kern = _ffn_kernel

    out = pl.pallas_call(
        kern,
        out_shape=jax.ShapeDtypeStruct((Mp, D), out_dtype),
        grid=(Mp // tm,),
        in_specs=in_specs,
        out_specs=pl.BlockSpec((tm, D), lambda i: (i, 0)),
        compiler_params=pltpu.CompilerParams(
            dimension_semantics=("parallel",),
            vmem_limit_bytes=VMEM_LIMIT),
    )(*args)
    if Mp != M:
        out = out[:M]
    return out.reshape(B, S, D)


def layer_norm_final(x, g, b):
    # Only used for the degenerate 0-layer Encoder; otherwise the final LN is
    # fused into the last layer's FFN kernel.
    B, S, D = x.shape
    M = B * S
    tm, Mp = _row_tiling(M, ROW_CAP)
    xf = x.reshape(M, D)
    if Mp != M:
        xf = jnp.pad(xf, ((0, Mp - M), (0, 0)))
    out = pl.pallas_call(
        _ln_kernel,
        out_shape=jax.ShapeDtypeStruct((Mp, D), x.dtype),
        grid=(Mp // tm,),
        in_specs=[pl.BlockSpec((tm, D), lambda i: (i, 0)),
                  _resident_spec((1, D)), _resident_spec((1, D))],
        out_specs=pl.BlockSpec((tm, D), lambda i: (i, 0)),
        compiler_params=pltpu.CompilerParams(
            dimension_semantics=("parallel",),
            vmem_limit_bytes=VMEM_LIMIT),
    )(xf, g, b)
    if Mp != M:
        out = out[:M]
    return out.reshape(B, S, D)


# ----------------------------- model glue -----------------------------

def encoder(params, query, key, mask, h):
    # TODO(synk): self.layer_attns (per-layer attention probabilities) is not
    # materialized; the attention maps live only inside the fused attention kernel.
    layers = params["layers"]
    if not layers:
        return layer_norm_final(query, params["norm_g"], params["norm_b"])

    out_dtype = query.dtype
    # residual stream + key kept in bf16 HBM between kernels; mask as int8.
    x = query.astype(jnp.bfloat16)
    key16 = key.astype(jnp.bfloat16)
    mask_i8 = None if mask is None else (mask != 0).astype(jnp.int8)

    n = len(layers)
    for li, lp in enumerate(layers):
        x = attn_sublayer(x, key16, mask_i8, lp, h)     # x + attn(LN1(x), key, key)
        if li == n - 1:                                 # fuse encoder-final LN here
            x = ffn_sublayer(x, lp,
                             final_norm=(params["norm_g"], params["norm_b"]),
                             out_dtype=out_dtype)
        else:
            x = ffn_sublayer(x, lp)                     # x + W2(relu(W1(LN2(x))))
    return x


def init_params(rng, N, D, d_ff):
    # Weights are stored pre-cast to bf16 with Wk|Wv / bk|bv pre-concatenated,
    # so no per-forward concat/cast ops are emitted. Biases / LN params stay f32.
    def rnd(k, shape):
        return 0.02 * jax.random.normal(k, shape, jnp.float32)

    keys = jax.random.split(rng, max(N, 1) * 6)
    layers = []
    for i in range(N):
        k = keys[6 * i:6 * (i + 1)]
        wq, wk, wv, wo = (rnd(k[j], (D, D)) for j in range(4))
        w1 = rnd(k[4], (D, d_ff))
        w2 = rnd(k[5], (d_ff, D))
        layers.append({
            "wq": wq.astype(jnp.bfloat16),
            "wkv": jnp.concatenate([wk, wv], axis=1).astype(jnp.bfloat16),
            "wo": wo.astype(jnp.bfloat16),
            "w1": w1.astype(jnp.bfloat16),
            "w2": w2.astype(jnp.bfloat16),
            "bq": jnp.zeros((1, D), jnp.float32),
            "bkv": jnp.zeros((1, 2 * D), jnp.float32),
            "bo": jnp.zeros((1, D), jnp.float32),
            "b1": jnp.zeros((1, d_ff), jnp.float32),
            "b2": jnp.zeros((1, D), jnp.float32),
            "ln1_g": jnp.ones((1, D), jnp.float32),
            "ln1_b": jnp.zeros((1, D), jnp.float32),
            "ln2_g": jnp.ones((1, D), jnp.float32),
            "ln2_b": jnp.zeros((1, D), jnp.float32),
        })
    return {"layers": layers,
            "norm_g": jnp.ones((1, D), jnp.float32),
            "norm_b": jnp.zeros((1, D), jnp.float32)}


if __name__ == "__main__":
    B, Sq, Sk, D, H, DFF, N = 2, 8, 16, 32, 4, 64, 2
    root = jax.random.PRNGKey(0)
    kq, kk, kp = jax.random.split(root, 3)
    query = jax.random.normal(kq, (B, Sq, D), jnp.float32)
    key = jax.random.normal(kk, (B, Sk, D), jnp.float32)
    # mask: 1.0 = attend; mask the last 4 key positions of batch element 1
    mask = jnp.ones((B, Sq, Sk), jnp.float32).at[1, :, Sk - 4:].set(0.0)

    params = init_params(kp, N, D, DFF)

    run = jax.jit(functools.partial(encoder, h=H))
    out = run(params, query, key, mask)
    jax.block_until_ready(out)

    assert out.shape == (B, Sq, D)
    assert out.dtype == query.dtype
    assert bool(jnp.all(jnp.isfinite(out)))
    print("KERNEL_OK")
</pallas_src>

<mosaic_0001>
module attributes {stable_mosaic.version = 11 : i64} {
  func.func @_attn_kernel_masked(%arg0: i32, %arg1: i32, %arg2: memref<1x8x32xbf16, #tpu.memory_space<vmem>>, %arg3: memref<1x16x32xbf16, #tpu.memory_space<vmem>>, %arg4: memref<1x8x16xi8, #tpu.memory_space<vmem>>, %arg5: memref<1x32xf32, #tpu.memory_space<vmem>>, %arg6: memref<1x32xf32, #tpu.memory_space<vmem>>, %arg7: memref<32x32xbf16, #tpu.memory_space<vmem>>, %arg8: memref<1x32xf32, #tpu.memory_space<vmem>>, %arg9: memref<32x64xbf16, #tpu.memory_space<vmem>>, %arg10: memref<1x64xf32, #tpu.memory_space<vmem>>, %arg11: memref<32x32xbf16, #tpu.memory_space<vmem>>, %arg12: memref<1x32xf32, #tpu.memory_space<vmem>>, %arg13: memref<1x8x32xbf16, #tpu.memory_space<vmem>>, %arg14: memref<8x32xf32, #tpu.memory_space<vmem>>) attributes {dimension_semantics = [#tpu.dimension_semantics<parallel>, #tpu.dimension_semantics<parallel>], iteration_bounds = array<i64: 2, 1>, scalar_prefetch = 0 : i64, scratch_operands = 1 : i64, tpu.core_type = #tpu.core_type<tc>, window_params = [{transform_indices = @transform_0, window_bounds = array<i64: 1, 8, 32>}, {transform_indices = @transform_1, window_bounds = array<i64: 1, 16, 32>}, {transform_indices = @transform_2, window_bounds = array<i64: 1, 8, 16>}, {pipeline_mode = #tpu.pipeline_mode<synchronous>, transform_indices = @transform_3, window_bounds = array<i64: 1, 32>}, {pipeline_mode = #tpu.pipeline_mode<synchronous>, transform_indices = @transform_4, window_bounds = array<i64: 1, 32>}, {pipeline_mode = #tpu.pipeline_mode<synchronous>, transform_indices = @transform_5, window_bounds = array<i64: 32, 32>}, {pipeline_mode = #tpu.pipeline_mode<synchronous>, transform_indices = @transform_6, window_bounds = array<i64: 1, 32>}, {pipeline_mode = #tpu.pipeline_mode<synchronous>, transform_indices = @transform_7, window_bounds = array<i64: 32, 64>}, {pipeline_mode = #tpu.pipeline_mode<synchronous>, transform_indices = @transform_8, window_bounds = array<i64: 1, 64>}, {pipeline_mode = #tpu.pipeline_mode<synchronous>, transform_indices = @transform_9, window_bounds = array<i64: 32, 32>}, {pipeline_mode = #tpu.pipeline_mode<synchronous>, transform_indices = @transform_10, window_bounds = array<i64: 1, 32>}, {transform_indices = @transform_11, window_bounds = array<i64: 1, 8, 32>}]} {
    %c0 = arith.constant 0 : index
    %c0_0 = arith.constant 0 : index
    %c0_1 = arith.constant 0 : index
    %0 = vector.load %arg2[%c0, %c0_0, %c0_1] : memref<1x8x32xbf16, #tpu.memory_space<vmem>>, vector<1x8x32xbf16>
    %1 = vector.shape_cast %0 : vector<1x8x32xbf16> to vector<8x32xbf16>
    %2 = arith.extf %1 : vector<8x32xbf16> to vector<8x32xf32>
    %c0_2 = arith.constant 0 : index
    %c0_3 = arith.constant 0 : index
    %c0_4 = arith.constant 0 : index
    %3 = vector.load %arg3[%c0_2, %c0_3, %c0_4] : memref<1x16x32xbf16, #tpu.memory_space<vmem>>, vector<1x16x32xbf16>
    %4 = vector.shape_cast %3 : vector<1x16x32xbf16> to vector<16x32xbf16>
    %c0_5 = arith.constant 0 : index
    %c0_6 = arith.constant 0 : index
    %5 = vector.load %arg5[%c0_5, %c0_6] : memref<1x32xf32, #tpu.memory_space<vmem>>, vector<1x32xf32>
    %c0_7 = arith.constant 0 : index
    %c0_8 = arith.constant 0 : index
    %6 = vector.load %arg6[%c0_7, %c0_8] : memref<1x32xf32, #tpu.memory_space<vmem>>, vector<1x32xf32>
    %cst = arith.constant dense<0.000000e+00> : vector<8xf32>
    %7 = vector.multi_reduction <add>, %2, %cst [1] : vector<8x32xf32> to vector<8xf32>
    %8 = vector.shape_cast %7 : vector<8xf32> to vector<8x1xf32>
    %cst_9 = arith.constant 3.200000e+01 : f32
    %9 = vector.broadcast %cst_9 : f32 to vector<8x1xf32>
    %10 = arith.divf %8, %9 : vector<8x1xf32>
    %11 = vector.broadcast %10 : vector<8x1xf32> to vector<8x32xf32>
    %12 = arith.subf %2, %11 : vector<8x32xf32>
    %13 = arith.mulf %12, %12 : vector<8x32xf32>
    %cst_10 = arith.constant dense<0.000000e+00> : vector<8xf32>
    %14 = vector.multi_reduction <add>, %13, %cst_10 [1] : vector<8x32xf32> to vector<8xf32>
    %15 = vector.shape_cast %14 : vector<8xf32> to vector<8x1xf32>
    %cst_11 = arith.constant 0.0322580636 : f32
    %16 = vector.broadcast %cst_11 : f32 to vector<8x1xf32>
    %17 = arith.mulf %15, %16 : vector<8x1xf32>
    %18 = math.sqrt %17 : vector<8x1xf32>
    %cst_12 = arith.constant 9.99999997E-7 : f32
    %19 = vector.broadcast %cst_12 : f32 to vector<8x1xf32>
    %20 = arith.addf %18, %19 : vector<8x1xf32>
    %21 = vector.broadcast %20 : vector<8x1xf32> to vector<8x32xf32>
    %22 = arith.divf %12, %21 : vector<8x32xf32>
    %23 = vector.broadcast %5 : vector<1x32xf32> to vector<8x32xf32>
    %24 = arith.mulf %23, %22 : vector<8x32xf32>
    %25 = vector.broadcast %6 : vector<1x32xf32> to vector<8x32xf32>
    %26 = arith.addf %24, %25 : vector<8x32xf32>
    %27 = arith.truncf %26 : vector<8x32xf32> to vector<8x32xbf16>
    %c0_13 = arith.constant 0 : index
    %c0_14 = arith.constant 0 : index
    %28 = vector.load %arg7[%c0_13, %c0_14] : memref<32x32xbf16, #tpu.memory_space<vmem>>, vector<32x32xbf16>
    %cst_15 = arith.constant dense<0.000000e+00> : vector<8x32xf32>
    %29 = tpu.matmul %27, %28, %cst_15 {dimension_numbers = #tpu.dot_dimension_numbers<[1], [0], [0], [1], [0, 0, 1, 1], [], []>} : vector<8x32xbf16>, vector<32x32xbf16>, vector<8x32xf32> -> vector<8x32xf32>
    %c0_16 = arith.constant 0 : index
    %c0_17 = arith.constant 0 : index
    %30 = vector.load %arg8[%c0_16, %c0_17] : memref<1x32xf32, #tpu.memory_space<vmem>>, vector<1x32xf32>
    %31 = vector.broadcast %30 : vector<1x32xf32> to vector<8x32xf32>
    %32 = arith.addf %29, %31 : vector<8x32xf32>
    %c0_18 = arith.constant 0 : index
    %c0_19 = arith.constant 0 : index
    %33 = vector.load %arg9[%c0_18, %c0_19] : memref<32x64xbf16, #tpu.memory_space<vmem>>, vector<32x64xbf16>
    %cst_20 = arith.constant dense<0.000000e+00> : vector<16x64xf32>
    %34 = tpu.matmul %4, %33, %cst_20 {dimension_numbers = #tpu.dot_dimension_numbers<[1], [0], [0], [1], [0, 0, 1, 1], [], []>} : vector<16x32xbf16>, vector<32x64xbf16>, vector<16x64xf32> -> vector<16x64xf32>
    %c0_21 = arith.constant 0 : index
    %c0_22 = arith.constant 0 : index
    %35 = vector.load %arg10[%c0_21, %c0_22] : memref<1x64xf32, #tpu.memory_space<vmem>>, vector<1x64xf32>
    %36 = vector.broadcast %35 : vector<1x64xf32> to vector<16x64xf32>
    %37 = arith.addf %34, %36 : vector<16x64xf32>
    %38 = arith.truncf %32 : vector<8x32xf32> to vector<8x32xbf16>
    %39 = vector.extract_strided_slice %37 {offsets = [0, 0], sizes = [16, 32], strides = [1, 1]} : vector<16x64xf32> to vector<16x32xf32>
    %40 = arith.truncf %39 : vector<16x32xf32> to vector<16x32xbf16>
    %41 = vector.extract_strided_slice %37 {offsets = [0, 32], sizes = [16, 32], strides = [1, 1]} : vector<16x64xf32> to vector<16x32xf32>
    %42 = arith.truncf %41 : vector<16x32xf32> to vector<16x32xbf16>
    %c0_23 = arith.constant 0 : index
    %c0_24 = arith.constant 0 : index
    %c0_25 = arith.constant 0 : index
    %43 = vector.load %arg4[%c0_23, %c0_24, %c0_25] : memref<1x8x16xi8, #tpu.memory_space<vmem>>, vector<1x8x16xi8>
    %44 = vector.shape_cast %43 : vector<1x8x16xi8> to vector<8x16xi8>
    %45 = arith.sitofp %44 : vector<8x16xi8> to vector<8x16xf32>
    %cst_26 = arith.constant 0.000000e+00 : f32
    %46 = vector.broadcast %cst_26 : f32 to vector<8x16xf32>
    %47 = arith.cmpf ogt, %45, %46 : vector<8x16xf32>
    %48 = vector.extract_strided_slice %38 {offsets = [0, 0], sizes = [8, 8], strides = [1, 1]} : vector<8x32xbf16> to vector<8x8xbf16>
    %49 = vector.extract_strided_slice %40 {offsets = [0, 0], sizes = [16, 8], strides = [1, 1]} : vector<16x32xbf16> to vector<16x8xbf16>
    %cst_27 = arith.constant dense<0.000000e+00> : vector<8x16xf32>
    %50 = tpu.matmul %48, %49, %cst_27 {dimension_numbers = #tpu.dot_dimension_numbers<[1], [1], [0], [0], [0, 0, 1, 0], [], []>} : vector<8x8xbf16>, vector<16x8xbf16>, vector<8x16xf32> -> vector<8x16xf32>
    %cst_28 = arith.constant 0.353553385 : f32
    %51 = vector.broadcast %cst_28 : f32 to vector<8x16xf32>
    %52 = arith.mulf %50, %51 : vector<8x16xf32>
    %cst_29 = arith.constant -1.000000e+09 : f32
    %53 = vector.broadcast %cst_29 : f32 to vector<8x16xf32>
    %54 = arith.select %47, %52, %53 : vector<8x16xi1>, vector<8x16xf32>
    %cst_30 = arith.constant dense<0xFF800000> : vector<8xf32>
    %55 = vector.multi_reduction <maximumf>, %54, %cst_30 [1] : vector<8x16xf32> to vector<8xf32>
    %56 = vector.shape_cast %55 : vector<8xf32> to vector<8x1xf32>
    %57 = vector.broadcast %56 : vector<8x1xf32> to vector<8x16xf32>
    %58 = arith.subf %54, %57 : vector<8x16xf32>
    %59 = math.exp %58 : vector<8x16xf32>
    %cst_31 = arith.constant dense<0.000000e+00> : vector<8xf32>
    %60 = vector.multi_reduction <add>, %59, %cst_31 [1] : vector<8x16xf32> to vector<8xf32>
    %61 = vector.shape_cast %60 : vector<8xf32> to vector<8x1xf32>
    %62 = arith.truncf %59 : vector<8x16xf32> to vector<8x16xbf16>
    %63 = vector.extract_strided_slice %42 {offsets = [0, 0], sizes = [16, 8], strides = [1, 1]} : vector<16x32xbf16> to vector<16x8xbf16>
    %cst_32 = arith.constant dense<0.000000e+00> : vector<8x8xf32>
    %64 = tpu.matmul %62, %63, %cst_32 {dimension_numbers = #tpu.dot_dimension_numbers<[1], [0], [0], [1], [0, 0, 1, 1], [], []>} : vector<8x16xbf16>, vector<16x8xbf16>, vector<8x8xf32> -> vector<8x8xf32>
    %65 = tpu.reciprocal %61 {approx = true} : vector<8x1xf32> -> vector<8x1xf32>
    %66 = vector.broadcast %65 : vector<8x1xf32> to vector<8x8xf32>
    %67 = arith.mulf %64, %66 : vector<8x8xf32>
    %c0_33 = arith.constant 0 : index
    %c0_34 = arith.constant 0 : index
    %68 = vector.load %arg14[%c0_33, %c0_34] : memref<8x32xf32, #tpu.memory_space<vmem>>, vector<8x8xf32>
    tpu.vector_store %arg14[%c0_33, %c0_34], %67 {strides = array<i32>} : memref<8x32xf32, #tpu.memory_space<vmem>>, vector<8x8xf32>,
    %69 = vector.extract_strided_slice %38 {offsets = [0, 8], sizes = [8, 8], strides = [1, 1]} : vector<8x32xbf16> to vector<8x8xbf16>
    %70 = vector.extract_strided_slice %40 {offsets = [0, 8], sizes = [16, 8], strides = [1, 1]} : vector<16x32xbf16> to vector<16x8xbf16>
    %cst_35 = arith.constant dense<0.000000e+00> : vector<8x16xf32>
    %71 = tpu.matmul %69, %70, %cst_35 {dimension_numbers = #tpu.dot_dimension_numbers<[1], [1], [0], [0], [0, 0, 1, 0], [], []>} : vector<8x8xbf16>, vector<16x8xbf16>, vector<8x16xf32> -> vector<8x16xf32>
    %cst_36 = arith.constant 0.353553385 : f32
    %72 = vector.broadcast %cst_36 : f32 to vector<8x16xf32>
    %73 = arith.mulf %71, %72 : vector<8x16xf32>
    %cst_37 = arith.constant -1.000000e+09 : f32
    %74 = vector.broadcast %cst_37 : f32 to vector<8x16xf32>
    %75 = arith.select %47, %73, %74 : vector<8x16xi1>, vector<8x16xf32>
    %cst_38 = arith.constant dense<0xFF800000> : vector<8xf32>
    %76 = vector.multi_reduction <maximumf>, %75, %cst_38 [1] : vector<8x16xf32> to vector<8xf32>
    %77 = vector.shape_cast %76 : vector<8xf32> to vector<8x1xf32>
    %78 = vector.broadcast %77 : vector<8x1xf32> to vector<8x16xf32>
    %79 = arith.subf %75, %78 : vector<8x16xf32>
    %80 = math.exp %79 : vector<8x16xf32>
    %cst_39 = arith.constant dense<0.000000e+00> : vector<8xf32>
    %81 = vector.multi_reduction <add>, %80, %cst_39 [1] : vector<8x16xf32> to vector<8xf32>
    %82 = vector.shape_cast %81 : vector<8xf32> to vector<8x1xf32>
    %83 = arith.truncf %80 : vector<8x16xf32> to vector<8x16xbf16>
    %84 = vector.extract_strided_slice %42 {offsets = [0, 8], sizes = [16, 8], strides = [1, 1]} : vector<16x32xbf16> to vector<16x8xbf16>
    %cst_40 = arith.constant dense<0.000000e+00> : vector<8x8xf32>
    %85 = tpu.matmul %83, %84, %cst_40 {dimension_numbers = #tpu.dot_dimension_numbers<[1], [0], [0], [1], [0, 0, 1, 1], [], []>} : vector<8x16xbf16>, vector<16x8xbf16>, vector<8x8xf32> -> vector<8x8xf32>
    %86 = tpu.reciprocal %82 {approx = true} : vector<8x1xf32> -> vector<8x1xf32>
    %87 = vector.broadcast %86 : vector<8x1xf32> to vector<8x8xf32>
    %88 = arith.mulf %85, %87 : vector<8x8xf32>
    %c0_41 = arith.constant 0 : index
    %c8 = arith.constant 8 : index
    %89 = vector.load %arg14[%c0_41, %c8] : memref<8x32xf32, #tpu.memory_space<vmem>>, vector<8x8xf32>
    tpu.vector_store %arg14[%c0_41, %c8], %88 {strides = array<i32>} : memref<8x32xf32, #tpu.memory_space<vmem>>, vector<8x8xf32>,
    %90 = vector.extract_strided_slice %38 {offsets = [0, 16], sizes = [8, 8], strides = [1, 1]} : vector<8x32xbf16> to vector<8x8xbf16>
    %91 = vector.extract_strided_slice %40 {offsets = [0, 16], sizes = [16, 8], strides = [1, 1]} : vector<16x32xbf16> to vector<16x8xbf16>
    %cst_42 = arith.constant dense<0.000000e+00> : vector<8x16xf32>
    %92 = tpu.matmul %90, %91, %cst_42 {dimension_numbers = #tpu.dot_dimension_numbers<[1], [1], [0], [0], [0, 0, 1, 0], [], []>} : vector<8x8xbf16>, vector<16x8xbf16>, vector<8x16xf32> -> vector<8x16xf32>
    %cst_43 = arith.constant 0.353553385 : f32
    %93 = vector.broadcast %cst_43 : f32 to vector<8x16xf32>
    %94 = arith.mulf %92, %93 : vector<8x16xf32>
    %cst_44 = arith.constant -1.000000e+09 : f32
    %95 = vector.broadcast %cst_44 : f32 to vector<8x16xf32>
    %96 = arith.select %47, %94, %95 : vector<8x16xi1>, vector<8x16xf32>
    %cst_45 = arith.constant dense<0xFF800000> : vector<8xf32>
    %97 = vector.multi_reduction <maximumf>, %96, %cst_45 [1] : vector<8x16xf32> to vector<8xf32>
    %98 = vector.shape_cast %97 : vector<8xf32> to vector<8x1xf32>
    %99 = vector.broadcast %98 : vector<8x1xf32> to vector<8x16xf32>
    %100 = arith.subf %96, %99 : vector<8x16xf32>
    %101 = math.exp %100 : vector<8x16xf32>
    %cst_46 = arith.constant dense<0.000000e+00> : vector<8xf32>
    %102 = vector.multi_reduction <add>, %101, %cst_46 [1] : vector<8x16xf32> to vector<8xf32>
    %103 = vector.shape_cast %102 : vector<8xf32> to vector<8x1xf32>
    %104 = arith.truncf %101 : vector<8x16xf32> to vector<8x16xbf16>
    %105 = vector.extract_strided_slice %42 {offsets = [0, 16], sizes = [16, 8], strides = [1, 1]} : vector<16x32xbf16> to vector<16x8xbf16>
    %cst_47 = arith.constant dense<0.000000e+00> : vector<8x8xf32>
    %106 = tpu.matmul %104, %105, %cst_47 {dimension_numbers = #tpu.dot_dimension_numbers<[1], [0], [0], [1], [0, 0, 1, 1], [], []>} : vector<8x16xbf16>, vector<16x8xbf16>, vector<8x8xf32> -> vector<8x8xf32>
    %107 = tpu.reciprocal %103 {approx = true} : vector<8x1xf32> -> vector<8x1xf32>
    %108 = vector.broadcast %107 : vector<8x1xf32> to vector<8x8xf32>
    %109 = arith.mulf %106, %108 : vector<8x8xf32>
    %c0_48 = arith.constant 0 : index
    %c16 = arith.constant 16 : index
    %110 = vector.load %arg14[%c0_48, %c16] : memref<8x32xf32, #tpu.memory_space<vmem>>, vector<8x8xf32>
    tpu.vector_store %arg14[%c0_48, %c16], %109 {strides = array<i32>} : memref<8x32xf32, #tpu.memory_space<vmem>>, vector<8x8xf32>,
    %111 = vector.extract_strided_slice %38 {offsets = [0, 24], sizes = [8, 8], strides = [1, 1]} : vector<8x32xbf16> to vector<8x8xbf16>
    %112 = vector.extract_strided_slice %40 {offsets = [0, 24], sizes = [16, 8], strides = [1, 1]} : vector<16x32xbf16> to vector<16x8xbf16>
    %cst_49 = arith.constant dense<0.000000e+00> : vector<8x16xf32>
    %113 = tpu.matmul %111, %112, %cst_49 {dimension_numbers = #tpu.dot_dimension_numbers<[1], [1], [0], [0], [0, 0, 1, 0], [], []>} : vector<8x8xbf16>, vector<16x8xbf16>, vector<8x16xf32> -> vector<8x16xf32>
    %cst_50 = arith.constant 0.353553385 : f32
    %114 = vector.broadcast %cst_50 : f32 to vector<8x16xf32>
    %115 = arith.mulf %113, %114 : vector<8x16xf32>
    %cst_51 = arith.constant -1.000000e+09 : f32
    %116 = vector.broadcast %cst_51 : f32 to vector<8x16xf32>
    %117 = arith.select %47, %115, %116 : vector<8x16xi1>, vector<8x16xf32>
    %cst_52 = arith.constant dense<0xFF800000> : vector<8xf32>
    %118 = vector.multi_reduction <maximumf>, %117, %cst_52 [1] : vector<8x16xf32> to vector<8xf32>
    %119 = vector.shape_cast %118 : vector<8xf32> to vector<8x1xf32>
    %120 = vector.broadcast %119 : vector<8x1xf32> to vector<8x16xf32>
    %121 = arith.subf %117, %120 : vector<8x16xf32>
    %122 = math.exp %121 : vector<8x16xf32>
    %cst_53 = arith.constant dense<0.000000e+00> : vector<8xf32>
    %123 = vector.multi_reduction <add>, %122, %cst_53 [1] : vector<8x16xf32> to vector<8xf32>
    %124 = vector.shape_cast %123 : vector<8xf32> to vector<8x1xf32>
    %125 = arith.truncf %122 : vector<8x16xf32> to vector<8x16xbf16>
    %126 = vector.extract_strided_slice %42 {offsets = [0, 24], sizes = [16, 8], strides = [1, 1]} : vector<16x32xbf16> to vector<16x8xbf16>
    %cst_54 = arith.constant dense<0.000000e+00> : vector<8x8xf32>
    %127 = tpu.matmul %125, %126, %cst_54 {dimension_numbers = #tpu.dot_dimension_numbers<[1], [0], [0], [1], [0, 0, 1, 1], [], []>} : vector<8x16xbf16>, vector<16x8xbf16>, vector<8x8xf32> -> vector<8x8xf32>
    %128 = tpu.reciprocal %124 {approx = true} : vector<8x1xf32> -> vector<8x1xf32>
    %129 = vector.broadcast %128 : vector<8x1xf32> to vector<8x8xf32>
    %130 = arith.mulf %127, %129 : vector<8x8xf32>
    %c0_55 = arith.constant 0 : index
    %c24 = arith.constant 24 : index
    %131 = vector.load %arg14[%c0_55, %c24] : memref<8x32xf32, #tpu.memory_space<vmem>>, vector<8x8xf32>
    tpu.vector_store %arg14[%c0_55, %c24], %130 {strides = array<i32>} : memref<8x32xf32, #tpu.memory_space<vmem>>, vector<8x8xf32>,
    %c0_56 = arith.constant 0 : index
    %c0_57 = arith.constant 0 : index
    %132 = vector.load %arg14[%c0_56, %c0_57] : memref<8x32xf32, #tpu.memory_space<vmem>>, vector<8x32xf32>
    %133 = arith.truncf %132 : vector<8x32xf32> to vector<8x32xbf16>
    %c0_58 = arith.constant 0 : index
    %c0_59 = arith.constant 0 : index
    %134 = vector.load %arg11[%c0_58, %c0_59] : memref<32x32xbf16, #tpu.memory_space<vmem>>, vector<32x32xbf16>
    %cst_60 = arith.constant dense<0.000000e+00> : vector<8x32xf32>
    %135 = tpu.matmul %133, %134, %cst_60 {dimension_numbers = #tpu.dot_dimension_numbers<[1], [0], [0], [1], [0, 0, 1, 1], [], []>} : vector<8x32xbf16>, vector<32x32xbf16>, vector<8x32xf32> -> vector<8x32xf32>
    %c0_61 = arith.constant 0 : index
    %c0_62 = arith.constant 0 : index
    %136 = vector.load %arg12[%c0_61, %c0_62] : memref<1x32xf32, #tpu.memory_space<vmem>>, vector<1x32xf32>
    %137 = vector.broadcast %136 : vector<1x32xf32> to vector<8x32xf32>
    %138 = arith.addf %135, %137 : vector<8x32xf32>
    %139 = arith.addf %138, %2 : vector<8x32xf32>
    %140 = arith.truncf %139 : vector<8x32xf32> to vector<8x32xbf16>
    %c0_63 = arith.constant 0 : index
    %c0_64 = arith.constant 0 : index
    %c0_65 = arith.constant 0 : index
    %141 = vector.load %arg13[%c0_63, %c0_64, %c0_65] : memref<1x8x32xbf16, #tpu.memory_space<vmem>>, vector<1x8x32xbf16>
    %142 = vector.shape_cast %141 : vector<1x8x32xbf16> to vector<8x32xbf16>
    %143 = vector.shape_cast %140 : vector<8x32xbf16> to vector<1x8x32xbf16>
    tpu.vector_store %arg13[%c0_63, %c0_64, %c0_65], %143 {strides = array<i32>} : memref<1x8x32xbf16, #tpu.memory_space<vmem>>, vector<1x8x32xbf16>,
    return
  }
  func.func @transform_0(%arg0: i32, %arg1: i32) -> (i32, i32, i32) {
    %c0_i32 = arith.constant 0 : i32
    %c0_i32_0 = arith.constant 0 : i32
    return %arg0, %arg1, %c0_i32 : i32, i32, i32
  }
  func.func @transform_1(%arg0: i32, %arg1: i32) -> (i32, i32, i32) {
    %c0_i32 = arith.constant 0 : i32
    %c0_i32_0 = arith.constant 0 : i32
    %c0_i32_1 = arith.constant 0 : i32
    return %arg0, %c0_i32, %c0_i32_0 : i32, i32, i32
  }
  func.func @transform_2(%arg0: i32, %arg1: i32) -> (i32, i32, i32) {
    %c0_i32 = arith.constant 0 : i32
    %c0_i32_0 = arith.constant 0 : i32
    return %arg0, %arg1, %c0_i32 : i32, i32, i32
  }
  func.func @transform_3(%arg0: i32, %arg1: i32) -> (i32, i32) {
    %c0_i32 = arith.constant 0 : i32
    %c0_i32_0 = arith.constant 0 : i32
    %c0_i32_1 = arith.constant 0 : i32
    return %c0_i32, %c0_i32_0 : i32, i32
  }
  func.func @transform_4(%arg0: i32, %arg1: i32) -> (i32, i32) {
    %c0_i32 = arith.constant 0 : i32
    %c0_i32_0 = arith.constant 0 : i32
    %c0_i32_1 = arith.constant 0 : i32
    return %c0_i32, %c0_i32_0 : i32, i32
  }
  func.func @transform_5(%arg0: i32, %arg1: i32) -> (i32, i32) {
    %c0_i32 = arith.constant 0 : i32
    %c0_i32_0 = arith.constant 0 : i32
    %c0_i32_1 = arith.constant 0 : i32
    return %c0_i32, %c0_i32_0 : i32, i32
  }
  func.func @transform_6(%arg0: i32, %arg1: i32) -> (i32, i32) {
    %c0_i32 = arith.constant 0 : i32
    %c0_i32_0 = arith.constant 0 : i32
    %c0_i32_1 = arith.constant 0 : i32
    return %c0_i32, %c0_i32_0 : i32, i32
  }
  func.func @transform_7(%arg0: i32, %arg1: i32) -> (i32, i32) {
    %c0_i32 = arith.constant 0 : i32
    %c0_i32_0 = arith.constant 0 : i32
    %c0_i32_1 = arith.constant 0 : i32
    return %c0_i32, %c0_i32_0 : i32, i32
  }
  func.func @transform_8(%arg0: i32, %arg1: i32) -> (i32, i32) {
    %c0_i32 = arith.constant 0 : i32
    %c0_i32_0 = arith.constant 0 : i32
    %c0_i32_1 = arith.constant 0 : i32
    return %c0_i32, %c0_i32_0 : i32, i32
  }
  func.func @transform_9(%arg0: i32, %arg1: i32) -> (i32, i32) {
    %c0_i32 = arith.constant 0 : i32
    %c0_i32_0 = arith.constant 0 : i32
    %c0_i32_1 = arith.constant 0 : i32
    return %c0_i32, %c0_i32_0 : i32, i32
  }
  func.func @transform_10(%arg0: i32, %arg1: i32) -> (i32, i32) {
    %c0_i32 = arith.constant 0 : i32
    %c0_i32_0 = arith.constant 0 : i32
    %c0_i32_1 = arith.constant 0 : i32
    return %c0_i32, %c0_i32_0 : i32, i32
  }
  func.func @transform_11(%arg0: i32, %arg1: i32) -> (i32, i32, i32) {
    %c0_i32 = arith.constant 0 : i32
    %c0_i32_0 = arith.constant 0 : i32
    return %arg0, %arg1, %c0_i32 : i32, i32, i32
  }
}

module attributes {stable_mosaic.version = 11 : i64} {
  func.func @_ffn_final_kernel(%arg0: i32, %arg1: memref<16x32xbf16, #tpu.memory_space<vmem>>, %arg2: memref<1x32xf32, #tpu.memory_space<vmem>>, %arg3: memref<1x32xf32, #tpu.memory_space<vmem>>, %arg4: memref<32x64xbf16, #tpu.memory_space<vmem>>, %arg5: memref<1x64xf32, #tpu.memory_space<vmem>>, %arg6: memref<64x32xbf16, #tpu.memory_space<vmem>>, %arg7: memref<1x32xf32, #tpu.memory_space<vmem>>, %arg8: memref<1x32xf32, #tpu.memory_space<vmem>>, %arg9: memref<1x32xf32, #tpu.memory_space<vmem>>, %arg10: memref<16x32xf32, #tpu.memory_space<vmem>>) attributes {dimension_semantics = [#tpu.dimension_semantics<parallel>], iteration_bounds = array<i64: 1>, scalar_prefetch = 0 : i64, scratch_operands = 0 : i64, tpu.core_type = #tpu.core_type<tc>, window_params = [{transform_indices = @transform_0, window_bounds = array<i64: 16, 32>}, {pipeline_mode = #tpu.pipeline_mode<synchronous>, transform_indices = @transform_1, window_bounds = array<i64: 1, 32>}, {pipeline_mode = #tpu.pipeline_mode<synchronous>, transform_indices = @transform_2, window_bounds = array<i64: 1, 32>}, {pipeline_mode = #tpu.pipeline_mode<synchronous>, transform_indices = @transform_3, window_bounds = array<i64: 32, 64>}, {pipeline_mode = #tpu.pipeline_mode<synchronous>, transform_indices = @transform_4, window_bounds = array<i64: 1, 64>}, {pipeline_mode = #tpu.pipeline_mode<synchronous>, transform_indices = @transform_5, window_bounds = array<i64: 64, 32>}, {pipeline_mode = #tpu.pipeline_mode<synchronous>, transform_indices = @transform_6, window_bounds = array<i64: 1, 32>}, {pipeline_mode = #tpu.pipeline_mode<synchronous>, transform_indices = @transform_7, window_bounds = array<i64: 1, 32>}, {pipeline_mode = #tpu.pipeline_mode<synchronous>, transform_indices = @transform_8, window_bounds = array<i64: 1, 32>}, {transform_indices = @transform_9, window_bounds = array<i64: 16, 32>}]} {
    %c0 = arith.constant 0 : index
    %c0_0 = arith.constant 0 : index
    %0 = vector.load %arg1[%c0, %c0_0] : memref<16x32xbf16, #tpu.memory_space<vmem>>, vector<16x32xbf16>
    %1 = arith.extf %0 : vector<16x32xbf16> to vector<16x32xf32>
    %c0_1 = arith.constant 0 : index
    %c0_2 = arith.constant 0 : index
    %2 = vector.load %arg2[%c0_1, %c0_2] : memref<1x32xf32, #tpu.memory_space<vmem>>, vector<1x32xf32>
    %c0_3 = arith.constant 0 : index
    %c0_4 = arith.constant 0 : index
    %3 = vector.load %arg3[%c0_3, %c0_4] : memref<1x32xf32, #tpu.memory_space<vmem>>, vector<1x32xf32>
    %cst = arith.constant dense<0.000000e+00> : vector<16xf32>
    %4 = vector.multi_reduction <add>, %1, %cst [1] : vector<16x32xf32> to vector<16xf32>
    %5 = vector.shape_cast %4 : vector<16xf32> to vector<16x1xf32>
    %cst_5 = arith.constant 3.200000e+01 : f32
    %6 = vector.broadcast %cst_5 : f32 to vector<16x1xf32>
    %7 = arith.divf %5, %6 : vector<16x1xf32>
    %8 = vector.broadcast %7 : vector<16x1xf32> to vector<16x32xf32>
    %9 = arith.subf %1, %8 : vector<16x32xf32>
    %10 = arith.mulf %9, %9 : vector<16x32xf32>
    %cst_6 = arith.constant dense<0.000000e+00> : vector<16xf32>
    %11 = vector.multi_reduction <add>, %10, %cst_6 [1] : vector<16x32xf32> to vector<16xf32>
    %12 = vector.shape_cast %11 : vector<16xf32> to vector<16x1xf32>
    %cst_7 = arith.constant 0.0322580636 : f32
    %13 = vector.broadcast %cst_7 : f32 to vector<16x1xf32>
    %14 = arith.mulf %12, %13 : vector<16x1xf32>
    %15 = math.sqrt %14 : vector<16x1xf32>
    %cst_8 = arith.constant 9.99999997E-7 : f32
    %16 = vector.broadcast %cst_8 : f32 to vector<16x1xf32>
    %17 = arith.addf %15, %16 : vector<16x1xf32>
    %18 = vector.broadcast %17 : vector<16x1xf32> to vector<16x32xf32>
    %19 = arith.divf %9, %18 : vector<16x32xf32>
    %20 = vector.broadcast %2 : vector<1x32xf32> to vector<16x32xf32>
    %21 = arith.mulf %20, %19 : vector<16x32xf32>
    %22 = vector.broadcast %3 : vector<1x32xf32> to vector<16x32xf32>
    %23 = arith.addf %21, %22 : vector<16x32xf32>
    %24 = arith.truncf %23 : vector<16x32xf32> to vector<16x32xbf16>
    %c0_9 = arith.constant 0 : index
    %c0_10 = arith.constant 0 : index
    %25 = vector.load %arg4[%c0_9, %c0_10] : memref<32x64xbf16, #tpu.memory_space<vmem>>, vector<32x64xbf16>
    %cst_11 = arith.constant dense<0.000000e+00> : vector<16x64xf32>
    %26 = tpu.matmul %24, %25, %cst_11 {dimension_numbers = #tpu.dot_dimension_numbers<[1], [0], [0], [1], [0, 0, 1, 1], [], []>} : vector<16x32xbf16>, vector<32x64xbf16>, vector<16x64xf32> -> vector<16x64xf32>
    %c0_12 = arith.constant 0 : index
    %c0_13 = arith.constant 0 : index
    %27 = vector.load %arg5[%c0_12, %c0_13] : memref<1x64xf32, #tpu.memory_space<vmem>>, vector<1x64xf32>
    %28 = vector.broadcast %27 : vector<1x64xf32> to vector<16x64xf32>
    %29 = arith.addf %26, %28 : vector<16x64xf32>
    %cst_14 = arith.constant 0.000000e+00 : f32
    %30 = vector.broadcast %cst_14 : f32 to vector<16x64xf32>
    %31 = arith.maximumf %29, %30 : vector<16x64xf32>
    %32 = arith.truncf %31 : vector<16x64xf32> to vector<16x64xbf16>
    %c0_15 = arith.constant 0 : index
    %c0_16 = arith.constant 0 : index
    %33 = vector.load %arg6[%c0_15, %c0_16] : memref<64x32xbf16, #tpu.memory_space<vmem>>, vector<64x32xbf16>
    %cst_17 = arith.constant dense<0.000000e+00> : vector<16x32xf32>
    %34 = tpu.matmul %32, %33, %cst_17 {dimension_numbers = #tpu.dot_dimension_numbers<[1], [0], [0], [1], [0, 0, 1, 1], [], []>} : vector<16x64xbf16>, vector<64x32xbf16>, vector<16x32xf32> -> vector<16x32xf32>
    %c0_18 = arith.constant 0 : index
    %c0_19 = arith.constant 0 : index
    %35 = vector.load %arg7[%c0_18, %c0_19] : memref<1x32xf32, #tpu.memory_space<vmem>>, vector<1x32xf32>
    %36 = vector.broadcast %35 : vector<1x32xf32> to vector<16x32xf32>
    %37 = arith.addf %34, %36 : vector<16x32xf32>
    %38 = arith.addf %37, %1 : vector<16x32xf32>
    %c0_20 = arith.constant 0 : index
    %c0_21 = arith.constant 0 : index
    %39 = vector.load %arg8[%c0_20, %c0_21] : memref<1x32xf32, #tpu.memory_space<vmem>>, vector<1x32xf32>
    %c0_22 = arith.constant 0 : index
    %c0_23 = arith.constant 0 : index
    %40 = vector.load %arg9[%c0_22, %c0_23] : memref<1x32xf32, #tpu.memory_space<vmem>>, vector<1x32xf32>
    %cst_24 = arith.constant dense<0.000000e+00> : vector<16xf32>
    %41 = vector.multi_reduction <add>, %38, %cst_24 [1] : vector<16x32xf32> to vector<16xf32>
    %42 = vector.shape_cast %41 : vector<16xf32> to vector<16x1xf32>
    %cst_25 = arith.constant 3.200000e+01 : f32
    %43 = vector.broadcast %cst_25 : f32 to vector<16x1xf32>
    %44 = arith.divf %42, %43 : vector<16x1xf32>
    %45 = vector.broadcast %44 : vector<16x1xf32> to vector<16x32xf32>
    %46 = arith.subf %38, %45 : vector<16x32xf32>
    %47 = arith.mulf %46, %46 : vector<16x32xf32>
    %cst_26 = arith.constant dense<0.000000e+00> : vector<16xf32>
    %48 = vector.multi_reduction <add>, %47, %cst_26 [1] : vector<16x32xf32> to vector<16xf32>
    %49 = vector.shape_cast %48 : vector<16xf32> to vector<16x1xf32>
    %cst_27 = arith.constant 0.0322580636 : f32
    %50 = vector.broadcast %cst_27 : f32 to vector<16x1xf32>
    %51 = arith.mulf %49, %50 : vector<16x1xf32>
    %52 = math.sqrt %51 : vector<16x1xf32>
    %cst_28 = arith.constant 9.99999997E-7 : f32
    %53 = vector.broadcast %cst_28 : f32 to vector<16x1xf32>
    %54 = arith.addf %52, %53 : vector<16x1xf32>
    %55 = vector.broadcast %54 : vector<16x1xf32> to vector<16x32xf32>
    %56 = arith.divf %46, %55 : vector<16x32xf32>
    %57 = vector.broadcast %39 : vector<1x32xf32> to vector<16x32xf32>
    %58 = arith.mulf %57, %56 : vector<16x32xf32>
    %59 = vector.broadcast %40 : vector<1x32xf32> to vector<16x32xf32>
    %60 = arith.addf %58, %59 : vector<16x32xf32>
    %c0_29 = arith.constant 0 : index
    %c0_30 = arith.constant 0 : index
    %61 = vector.load %arg10[%c0_29, %c0_30] : memref<16x32xf32, #tpu.memory_space<vmem>>, vector<16x32xf32>
    tpu.vector_store %arg10[%c0_29, %c0_30], %60 {strides = array<i32>} : memref<16x32xf32, #tpu.memory_space<vmem>>, vector<16x32xf32>,
    return
  }
  func.func @transform_0(%arg0: i32) -> (i32, i32) {
    %c0_i32 = arith.constant 0 : i32
    %c0_i32_0 = arith.constant 0 : i32
    return %arg0, %c0_i32 : i32, i32
  }
  func.func @transform_1(%arg0: i32) -> (i32, i32) {
    %c0_i32 = arith.constant 0 : i32
    %c0_i32_0 = arith.constant 0 : i32
    %c0_i32_1 = arith.constant 0 : i32
    return %c0_i32, %c0_i32_0 : i32, i32
  }
  func.func @transform_2(%arg0: i32) -> (i32, i32) {
    %c0_i32 = arith.constant 0 : i32
    %c0_i32_0 = arith.constant 0 : i32
    %c0_i32_1 = arith.constant 0 : i32
    return %c0_i32, %c0_i32_0 : i32, i32
  }
  func.func @transform_3(%arg0: i32) -> (i32, i32) {
    %c0_i32 = arith.constant 0 : i32
    %c0_i32_0 = arith.constant 0 : i32
    %c0_i32_1 = arith.constant 0 : i32
    return %c0_i32, %c0_i32_0 : i32, i32
  }
  func.func @transform_4(%arg0: i32) -> (i32, i32) {
    %c0_i32 = arith.constant 0 : i32
    %c0_i32_0 = arith.constant 0 : i32
    %c0_i32_1 = arith.constant 0 : i32
    return %c0_i32, %c0_i32_0 : i32, i32
  }
  func.func @transform_5(%arg0: i32) -> (i32, i32) {
    %c0_i32 = arith.constant 0 : i32
    %c0_i32_0 = arith.constant 0 : i32
    %c0_i32_1 = arith.constant 0 : i32
    return %c0_i32, %c0_i32_0 : i32, i32
  }
  func.func @transform_6(%arg0: i32) -> (i32, i32) {
    %c0_i32 = arith.constant 0 : i32
    %c0_i32_0 = arith.constant 0 : i32
    %c0_i32_1 = arith.constant 0 : i32
    return %c0_i32, %c0_i32_0 : i32, i32
  }
  func.func @transform_7(%arg0: i32) -> (i32, i32) {
    %c0_i32 = arith.constant 0 : i32
    %c0_i32_0 = arith.constant 0 : i32
    %c0_i32_1 = arith.constant 0 : i32
    return %c0_i32, %c0_i32_0 : i32, i32
  }
  func.func @transform_8(%arg0: i32) -> (i32, i32) {
    %c0_i32 = arith.constant 0 : i32
    %c0_i32_0 = arith.constant 0 : i32
    %c0_i32_1 = arith.constant 0 : i32
    return %c0_i32, %c0_i32_0 : i32, i32
  }
  func.func @transform_9(%arg0: i32) -> (i32, i32) {
    %c0_i32 = arith.constant 0 : i32
    %c0_i32_0 = arith.constant 0 : i32
    return %arg0, %c0_i32 : i32, i32
  }
}

module attributes {stable_mosaic.version = 11 : i64} {
  func.func @_ffn_kernel(%arg0: i32, %arg1: memref<16x32xbf16, #tpu.memory_space<vmem>>, %arg2: memref<1x32xf32, #tpu.memory_space<vmem>>, %arg3: memref<1x32xf32, #tpu.memory_space<vmem>>, %arg4: memref<32x64xbf16, #tpu.memory_space<vmem>>, %arg5: memref<1x64xf32, #tpu.memory_space<vmem>>, %arg6: memref<64x32xbf16, #tpu.memory_space<vmem>>, %arg7: memref<1x32xf32, #tpu.memory_space<vmem>>, %arg8: memref<16x32xbf16, #tpu.memory_space<vmem>>) attributes {dimension_semantics = [#tpu.dimension_semantics<parallel>], iteration_bounds = array<i64: 1>, scalar_prefetch = 0 : i64, scratch_operands = 0 : i64, tpu.core_type = #tpu.core_type<tc>, window_params = [{transform_indices = @transform_0, window_bounds = array<i64: 16, 32>}, {pipeline_mode = #tpu.pipeline_mode<synchronous>, transform_indices = @transform_1, window_bounds = array<i64: 1, 32>}, {pipeline_mode = #tpu.pipeline_mode<synchronous>, transform_indices = @transform_2, window_bounds = array<i64: 1, 32>}, {pipeline_mode = #tpu.pipeline_mode<synchronous>, transform_indices = @transform_3, window_bounds = array<i64: 32, 64>}, {pipeline_mode = #tpu.pipeline_mode<synchronous>, transform_indices = @transform_4, window_bounds = array<i64: 1, 64>}, {pipeline_mode = #tpu.pipeline_mode<synchronous>, transform_indices = @transform_5, window_bounds = array<i64: 64, 32>}, {pipeline_mode = #tpu.pipeline_mode<synchronous>, transform_indices = @transform_6, window_bounds = array<i64: 1, 32>}, {transform_indices = @transform_7, window_bounds = array<i64: 16, 32>}]} {
    %c0 = arith.constant 0 : index
    %c0_0 = arith.constant 0 : index
    %0 = vector.load %arg1[%c0, %c0_0] : memref<16x32xbf16, #tpu.memory_space<vmem>>, vector<16x32xbf16>
    %1 = arith.extf %0 : vector<16x32xbf16> to vector<16x32xf32>
    %c0_1 = arith.constant 0 : index
    %c0_2 = arith.constant 0 : index
    %2 = vector.load %arg2[%c0_1, %c0_2] : memref<1x32xf32, #tpu.memory_space<vmem>>, vector<1x32xf32>
    %c0_3 = arith.constant 0 : index
    %c0_4 = arith.constant 0 : index
    %3 = vector.load %arg3[%c0_3, %c0_4] : memref<1x32xf32, #tpu.memory_space<vmem>>, vector<1x32xf32>
    %cst = arith.constant dense<0.000000e+00> : vector<16xf32>
    %4 = vector.multi_reduction <add>, %1, %cst [1] : vector<16x32xf32> to vector<16xf32>
    %5 = vector.shape_cast %4 : vector<16xf32> to vector<16x1xf32>
    %cst_5 = arith.constant 3.200000e+01 : f32
    %6 = vector.broadcast %cst_5 : f32 to vector<16x1xf32>
    %7 = arith.divf %5, %6 : vector<16x1xf32>
    %8 = vector.broadcast %7 : vector<16x1xf32> to vector<16x32xf32>
    %9 = arith.subf %1, %8 : vector<16x32xf32>
    %10 = arith.mulf %9, %9 : vector<16x32xf32>
    %cst_6 = arith.constant dense<0.000000e+00> : vector<16xf32>
    %11 = vector.multi_reduction <add>, %10, %cst_6 [1] : vector<16x32xf32> to vector<16xf32>
    %12 = vector.shape_cast %11 : vector<16xf32> to vector<16x1xf32>
    %cst_7 = arith.constant 0.0322580636 : f32
    %13 = vector.broadcast %cst_7 : f32 to vector<16x1xf32>
    %14 = arith.mulf %12, %13 : vector<16x1xf32>
    %15 = math.sqrt %14 : vector<16x1xf32>
    %cst_8 = arith.constant 9.99999997E-7 : f32
    %16 = vector.broadcast %cst_8 : f32 to vector<16x1xf32>
    %17 = arith.addf %15, %16 : vector<16x1xf32>
    %18 = vector.broadcast %17 : vector<16x1xf32> to vector<16x32xf32>
    %19 = arith.divf %9, %18 : vector<16x32xf32>
    %20 = vector.broadcast %2 : vector<1x32xf32> to vector<16x32xf32>
    %21 = arith.mulf %20, %19 : vector<16x32xf32>
    %22 = vector.broadcast %3 : vector<1x32xf32> to vector<16x32xf32>
    %23 = arith.addf %21, %22 : vector<16x32xf32>
    %24 = arith.truncf %23 : vector<16x32xf32> to vector<16x32xbf16>
    %c0_9 = arith.constant 0 : index
    %c0_10 = arith.constant 0 : index
    %25 = vector.load %arg4[%c0_9, %c0_10] : memref<32x64xbf16, #tpu.memory_space<vmem>>, vector<32x64xbf16>
    %cst_11 = arith.constant dense<0.000000e+00> : vector<16x64xf32>
    %26 = tpu.matmul %24, %25, %cst_11 {dimension_numbers = #tpu.dot_dimension_numbers<[1], [0], [0], [1], [0, 0, 1, 1], [], []>} : vector<16x32xbf16>, vector<32x64xbf16>, vector<16x64xf32> -> vector<16x64xf32>
    %c0_12 = arith.constant 0 : index
    %c0_13 = arith.constant 0 : index
    %27 = vector.load %arg5[%c0_12, %c0_13] : memref<1x64xf32, #tpu.memory_space<vmem>>, vector<1x64xf32>
    %28 = vector.broadcast %27 : vector<1x64xf32> to vector<16x64xf32>
    %29 = arith.addf %26, %28 : vector<16x64xf32>
    %cst_14 = arith.constant 0.000000e+00 : f32
    %30 = vector.broadcast %cst_14 : f32 to vector<16x64xf32>
    %31 = arith.maximumf %29, %30 : vector<16x64xf32>
    %32 = arith.truncf %31 : vector<16x64xf32> to vector<16x64xbf16>
    %c0_15 = arith.constant 0 : index
    %c0_16 = arith.constant 0 : index
    %33 = vector.load %arg6[%c0_15, %c0_16] : memref<64x32xbf16, #tpu.memory_space<vmem>>, vector<64x32xbf16>
    %cst_17 = arith.constant dense<0.000000e+00> : vector<16x32xf32>
    %34 = tpu.matmul %32, %33, %cst_17 {dimension_numbers = #tpu.dot_dimension_numbers<[1], [0], [0], [1], [0, 0, 1, 1], [], []>} : vector<16x64xbf16>, vector<64x32xbf16>, vector<16x32xf32> -> vector<16x32xf32>
    %c0_18 = arith.constant 0 : index
    %c0_19 = arith.constant 0 : index
    %35 = vector.load %arg7[%c0_18, %c0_19] : memref<1x32xf32, #tpu.memory_space<vmem>>, vector<1x32xf32>
    %36 = vector.broadcast %35 : vector<1x32xf32> to vector<16x32xf32>
    %37 = arith.addf %34, %36 : vector<16x32xf32>
    %38 = arith.addf %37, %1 : vector<16x32xf32>
    %39 = arith.truncf %38 : vector<16x32xf32> to vector<16x32xbf16>
    %c0_20 = arith.constant 0 : index
    %c0_21 = arith.constant 0 : index
    %40 = vector.load %arg8[%c0_20, %c0_21] : memref<16x32xbf16, #tpu.memory_space<vmem>>, vector<16x32xbf16>
    tpu.vector_store %arg8[%c0_20, %c0_21], %39 {strides = array<i32>} : memref<16x32xbf16, #tpu.memory_space<vmem>>, vector<16x32xbf16>,
    return
  }
  func.func @transform_0(%arg0: i32) -> (i32, i32) {
    %c0_i32 = arith.constant 0 : i32
    %c0_i32_0 = arith.constant 0 : i32
    return %arg0, %c0_i32 : i32, i32
  }
  func.func @transform_1(%arg0: i32) -> (i32, i32) {
    %c0_i32 = arith.constant 0 : i32
    %c0_i32_0 = arith.constant 0 : i32
    %c0_i32_1 = arith.constant 0 : i32
    return %c0_i32, %c0_i32_0 : i32, i32
  }
  func.func @transform_2(%arg0: i32) -> (i32, i32) {
    %c0_i32 = arith.constant 0 : i32
    %c0_i32_0 = arith.constant 0 : i32
    %c0_i32_1 = arith.constant 0 : i32
    return %c0_i32, %c0_i32_0 : i32, i32
  }
  func.func @transform_3(%arg0: i32) -> (i32, i32) {
    %c0_i32 = arith.constant 0 : i32
    %c0_i32_0 = arith.constant 0 : i32
    %c0_i32_1 = arith.constant 0 : i32
    return %c0_i32, %c0_i32_0 : i32, i32
  }
  func.func @transform_4(%arg0: i32) -> (i32, i32) {
    %c0_i32 = arith.constant 0 : i32
    %c0_i32_0 = arith.constant 0 : i32
    %c0_i32_1 = arith.constant 0 : i32
    return %c0_i32, %c0_i32_0 : i32, i32
  }
  func.func @transform_5(%arg0: i32) -> (i32, i32) {
    %c0_i32 = arith.constant 0 : i32
    %c0_i32_0 = arith.constant 0 : i32
    %c0_i32_1 = arith.constant 0 : i32
    return %c0_i32, %c0_i32_0 : i32, i32
  }
  func.func @transform_6(%arg0: i32) -> (i32, i32) {
    %c0_i32 = arith.constant 0 : i32
    %c0_i32_0 = arith.constant 0 : i32
    %c0_i32_1 = arith.constant 0 : i32
    return %c0_i32, %c0_i32_0 : i32, i32
  }
  func.func @transform_7(%arg0: i32) -> (i32, i32) {
    %c0_i32 = arith.constant 0 : i32
    %c0_i32_0 = arith.constant 0 : i32
    return %arg0, %c0_i32 : i32, i32
  }
}

</mosaic_0001>

<bundles_post_ra>
// kernel: encoder.7
= control target key start
LH: loop header
LB: loop body
LE: loop exit
PB: predicated region body
PF: predicated region fallthrough
CT: control target
= control target key end

     0   :  { %vm40_vm0 = vcmask 261120   ;;  %s544_s0 = inlined_call_operand.vmem [shape: bf16[16,32], index: 0, kind: input, shape index: {}]   ;;  %s545_s1 = inlined_call_operand.vmem [shape: f32[1,32], index: 1, kind: input, shape index: {}]   ;;  %s546_s2 = inlined_call_operand.vmem [shape: f32[1,32], index: 2, kind: input, shape index: {}]   ;;  %s547_s3 = inlined_call_operand.vmem [shape: bf16[32,64], index: 3, kind: input, shape index: {}]   ;;  %s548_s4 = inlined_call_operand.vmem [shape: f32[1,64], index: 4, kind: input, shape index: {}]   ;;  %s549_s5 = inlined_call_operand.vmem [shape: bf16[64,32], index: 5, kind: input, shape index: {}]   ;;  %s550_s6 = inlined_call_operand.vmem [shape: f32[1,32], index: 6, kind: input, shape index: {}]   ;;  %s551_s7 = inlined_call_operand.vmem [shape: f32[1,32], index: 7, kind: input, shape index: {}]   ;;  %s552_s8 = inlined_call_operand.vmem [shape: f32[1,32], index: 8, kind: input, shape index: {}]   ;;  %s553_s9 = inlined_call_operand.hbm [shape: f32[16,32], index: 9, kind: output, shape index: {}]  }
   0x1   :  { %v346_v0 = vld [vmem:[%s544_s0] sm:$0xff]  }
   0x2   :  { %v484_v1 = vunpack.c.l.bf16 %v346_v0  ;;  %v486_v2 = vunpack.c.h.bf16 %v346_v0 }
   0x4   :  { %v41_v3 = vsel %vm40_vm0, %v484_v1, 0.0 }
   0x5   :  { %42 = vadd.xlane.f32.xlu0 %v41_v3 }
   0x6   :  { %14 = vsyncpa [#allocation3], 0  ;;  %v44_v4 = vsel %vm40_vm0, %v486_v2, 0.0  ;;  %v382_v15 = vld [vmem:[%s547_s3 + $0x8] sm:$0xff]   ;;  %v426_v16 = vmov 0.0   ;;  %vm427_vm1 = vmmov 0  }
   0x7   :  { %357 = vmatprep.subr.bf16.mxu0 %v426_v16  ;;  %361 = vmatprep.mubr.msk.bf16.mxu0 %vm427_vm1, %v426_v16  ;;  %v383_v17 = vld [vmem:[%s547_s3] sm:$0xff]   ;;  %v384_v18 = vld [vmem:[%s549_s5 + $0x18] sm:$0xff]   ;;  %v385_v46 = vld [vmem:[%s549_s5 + $0x10] sm:$0xff]   ;;  %vm208_vm6 = vcmask 523264   ;;  %s428_s28 = smov [#allocation2]  }
   0x8   :  { %358 = vmatpush3.bf16.msra.mxu0 %v382_v15  ;;  %365 = vmatprep.subr.bf16.mxu1 %v426_v16  ;;  %v331_v37 = vld [vmem:[%s545_s1] ss:$0 sm:$0xff]  ;;  %v386_v47 = vld [vmem:[%s549_s5 + $0x8] sm:$0xff]   ;;  %s320_s29 = sshll.u32 %s428_s28, 4  ;;  %s321_s29 = int_to_ptr.vmem [resolvable:$true] %s320_s29 }
   0x9   :  { %45 = vadd.xlane.f32.xlu0 %v44_v4  ;;  %359 = vmatprep.subr.bf16.mxu0 %v426_v16  ;;  %v332_v41 = vld [vmem:[%s546_s2] ss:$0 sm:$0xff]  ;;  %s404_s30 = scalar_lea.vmem %s321_s29, 256  ;;  %p409_p1 = scmp.lt.s32.totalorder %s321_s29, %s321_s29 }
   0xa   :  { %373 = vmatprep.mubr.msk.bf16.mxu1 %vm427_vm1, %v426_v16  ;;  %366 = vmatpush3.bf16.msra.mxu1 %v384_v18  ;;  %v387_v48 = vld [vmem:[%s549_s5] sm:$0xff]   ;;  %p405_p0 = scmp.ne.s32.totalorder %s321_s29, %s404_s30  ;;  %p410_p2 = scmp.lt.s32.totalorder %s404_s30, %s404_s30 }
   0xb   :  { %367 = vmatprep.subr.bf16.mxu1 %v426_v16  ;;  %v333_v49 = vld [vmem:[%s548_s4] ss:$0 sm:$0xff] }
   0xc   :  { %360 = vmatpush3.bf16.msra.mxu0 %v383_v17  ;;  %v337_v59 = vld [vmem:[%s550_s6] ss:$0 sm:$0xff]  ;;  %p411_p3 = por %p410_p2, %p409_p1 }
   0xe   :  { %368 = vmatpush3.bf16.msra.mxu1 %v385_v46  ;;  %p412_p4 = pnand %p411_p3, %p405_p0 }
   0xf   :  { %369 = vmatprep.subr.bf16.mxu1 %v426_v16 }
  0x12   :  { %370 = vmatpush3.bf16.msra.mxu1 %v386_v47 }
  0x13   :  { %371 = vmatprep.subr.bf16.mxu1 %v426_v16 }
  0x16   :  { %372 = vmatpush3.bf16.msra.mxu1 %v387_v48 }
  0x8e   :  { %v43_v5 = vpop.xlane.xlu0 %42 }
  0x8f   :  { %v48_v6 = vmul.f32 0.03125, %v43_v5 }
  0x91   :  { %v50_v7 = vsub.f32 %v484_v1, %v48_v6 }
  0x92   :  { %v46_v8 = vpop.xlane.xlu0 %45 }
  0x93   :  { %v49_v9 = vmul.f32 0.03125, %v46_v8  ;;  %v52_v10 = vmul.f32 %v50_v7, %v50_v7 }
  0x95   :  { %v51_v11 = vsub.f32 %v486_v2, %v49_v9  ;;  %v54_v12 = vsel %vm40_vm0, %v52_v10, 0.0 }
  0x96   :  { %55 = vadd.xlane.f32.xlu1 %v54_v12 }
  0x97   :  { %v53_v13 = vmul.f32 %v51_v11, %v51_v11 }
  0x99   :  { %v57_v14 = vsel %vm40_vm0, %v53_v13, 0.0 }
  0x9a   :  { %58 = vadd.xlane.f32.xlu1 %v57_v14 }
 0x11f   :  { %v56_v19 = vpop.xlane.xlu1 %55 }
 0x120   :  { %v60_v20 = vmul.f32 0.032258064, %v56_v19 }
 0x122   :  { %388 = vrsqrt.f32 %v60_v20  ;;  %vm64_vm2 = vcmp.eq.f32.partialorder %v60_v20, inf  ;;  %v67_v25 = vand.u32 2147483648, %v60_v20  ;;  %vm66_vm3 = vcmp.eq.f32.partialorder %v60_v20, 0.0 }
 0x123   :  { %v59_v21 = vpop.xlane.xlu1 %58 }
 0x124   :  { %v61_v22 = vmul.f32 0.032258064, %v59_v21 }
 0x126   :  { %390 = vrsqrt.f32 %v61_v22  ;;  %vm71_vm4 = vcmp.eq.f32.partialorder %v61_v22, inf  ;;  %v74_v31 = vand.u32 2147483648, %v61_v22  ;;  %vm73_vm5 = vcmp.eq.f32.partialorder %v61_v22, 0.0 }
 0x12f   :  { %v389_v23 = vpop.eup %388 }
 0x130   :  { %v63_v24 = vmul.f32 %v389_v23, %v60_v20 }
 0x132   :  { %v65_v26 = vsel %vm64_vm2, %v60_v20, %v63_v24 }
 0x133   :  { %v391_v27 = vpop.eup %390  ;;  %v68_v28 = vsel %vm66_vm3, %v67_v25, %v65_v26 }
 0x134   :  { %v76_v29 = vadd.f32 1e-06, %v68_v28  ;;  %v70_v30 = vmul.f32 %v391_v27, %v61_v22 }
 0x136   :  { %392 = vrcp.f32 %v76_v29  ;;  %v72_v32 = vsel %vm71_vm4, %v61_v22, %v70_v30 }
 0x137   :  { %v75_v33 = vsel %vm73_vm5, %v74_v31, %v72_v32 }
 0x138   :  { %v77_v34 = vadd.f32 1e-06, %v75_v33  ;;  %v343_v33 = vld [vmem:[%s551_s7] ss:$0 sm:$0xff] }
 0x13a   :  { %394 = vrcp.f32 %v77_v34 }
 0x143   :  { %v393_v35 = vpop.eup %392 }
 0x144   :  { %v79_v36 = vmul.f32 %v393_v35, %v50_v7  ;;  %v344_v35 = vld [vmem:[%s552_s8] ss:$0 sm:$0xff] }
 0x146   :  { %v88_v40 = vmul.f32 %v331_v37, %v79_v36 }
 0x147   :  { %v395_v38 = vpop.eup %394 }
 0x148   :  { %v81_v39 = vmul.f32 %v395_v38, %v51_v11  ;;  %v96_v43 = vadd.f32 %v332_v41, %v88_v40 }
 0x14a   :  { %v89_v42 = vmul.f32 %v331_v37, %v81_v39 }
 0x14c   :  { %v97_v44 = vadd.f32 %v332_v41, %v89_v42 }
 0x14e   :  { %v98_v45 = vpack.c.bf16 %v97_v44, %v96_v43 }
 0x150   :  { %362 = vmatmul.mubr.msk.bf16.vlgmr.msra.gmra.mxu0 %vm40_vm0, %v98_v45 }
 0x210   :  { %v159_v50 = vpop.f32.mrf.mxu0 }
 0x211   :  { %v160_v52 = vadd.f32 %v333_v49, %v159_v50 }
 0x212   :  { %v363_v51 = vpop.f32.mrf.mxu0 }
 0x213   :  { %v166_v56 = vmax.f32 %v160_v52, 0.0 }
 0x214   :  { %v162_v53 = vpop.f32.mrf.mxu0 }
 0x215   :  { %v163_v54 = vadd.f32 %v333_v49, %v162_v53 }
 0x216   :  { %v364_v55 = vpop.f32.mrf.mxu0 }
 0x217   :  { %v167_v57 = vmax.f32 %v163_v54, 0.0 }
 0x219   :  { %v168_v58 = vpack.c.bf16 %v167_v57, %v166_v56 }
 0x21b   :  { %374 = vmatmul.mubr.msk.bf16.vlgmr.msra.gmra.mxu1 %vm208_vm6, %v168_v58 }
 0x2db   :  { %v246_v60 = vpop.f32.mrf.mxu1 }
 0x2dc   :  { %v247_v61 = vadd.f32 %v337_v59, %v246_v60 }
 0x2dd   :  { %v375_v62 = vpop.f32.mrf.mxu1 }
 0x2de   :  { %v253_v63 = vadd.f32 %v484_v1, %v247_v61 }
 0x2df   :  { %v249_v0 = vpop.f32.mrf.mxu1 }
 0x2e0   :  { %v250_v3 = vadd.f32 %v337_v59, %v249_v0  ;;  %v257_v4 = vsel %vm40_vm0, %v253_v63, 0.0 }
 0x2e1   :  { %258 = vadd.xlane.f32.xlu0 %v257_v4  ;;  %v376_v5 = vpop.f32.mrf.mxu1 }
 0x2e2   :  { %v254_v6 = vadd.f32 %v486_v2, %v250_v3 }
 0x2e4   :  { %v260_v7 = vsel %vm40_vm0, %v254_v6, 0.0 }
 0x2e5   :  { %261 = vadd.xlane.f32.xlu1 %v260_v7 }
 0x36a   :  { %v259_v8 = vpop.xlane.xlu0 %258 }
 0x36b   :  { %v263_v9 = vmul.f32 0.03125, %v259_v8 }
 0x36d   :  { %v265_v10 = vsub.f32 %v253_v63, %v263_v9 }
 0x36e   :  { %v262_v11 = vpop.xlane.xlu1 %261 }
 0x36f   :  { %v264_v12 = vmul.f32 0.03125, %v262_v11  ;;  %v267_v13 = vmul.f32 %v265_v10, %v265_v10 }
 0x371   :  { %v266_v14 = vsub.f32 %v254_v6, %v264_v12  ;;  %v269_v1 = vsel %vm40_vm0, %v267_v13, 0.0 }
 0x372   :  { %270 = vadd.xlane.f32.xlu0 %v269_v1 }
 0x373   :  { %v268_v15 = vmul.f32 %v266_v14, %v266_v14 }
 0x375   :  { %v272_v16 = vsel %vm40_vm0, %v268_v15, 0.0 }
 0x376   :  { %273 = vadd.xlane.f32.xlu1 %v272_v16 }
 0x3fb   :  { %v271_v17 = vpop.xlane.xlu0 %270 }
 0x3fc   :  { %v275_v18 = vmul.f32 0.032258064, %v271_v17 }
 0x3fe   :  { %396 = vrsqrt.f32 %v275_v18  ;;  %vm279_vm7 = vcmp.eq.f32.partialorder %v275_v18, inf  ;;  %v282_v22 = vand.u32 2147483648, %v275_v18  ;;  %vm281_vm8 = vcmp.eq.f32.partialorder %v275_v18, 0.0 }
 0x3ff   :  { %v274_v2 = vpop.xlane.xlu1 %273 }
 0x400   :  { %v276_v19 = vmul.f32 0.032258064, %v274_v2 }
 0x402   :  { %398 = vrsqrt.f32 %v276_v19  ;;  %vm286_vm9 = vcmp.eq.f32.partialorder %v276_v19, inf  ;;  %v289_v28 = vand.u32 2147483648, %v276_v19  ;;  %vm288_vm10 = vcmp.eq.f32.partialorder %v276_v19, 0.0 }
 0x40b   :  { %v397_v20 = vpop.eup %396 }
 0x40c   :  { %v278_v21 = vmul.f32 %v397_v20, %v275_v18 }
 0x40e   :  { %v280_v23 = vsel %vm279_vm7, %v275_v18, %v278_v21 }
 0x40f   :  { %v399_v24 = vpop.eup %398  ;;  %v283_v25 = vsel %vm281_vm8, %v282_v22, %v280_v23 }
 0x410   :  { %v291_v26 = vadd.f32 1e-06, %v283_v25  ;;  %v285_v27 = vmul.f32 %v399_v24, %v276_v19 }
 0x412   :  { %400 = vrcp.f32 %v291_v26  ;;  %v287_v29 = vsel %vm286_vm9, %v276_v19, %v285_v27 }
 0x413   :  { %v290_v30 = vsel %vm288_vm10, %v289_v28, %v287_v29 }
 0x414   :  { %v292_v31 = vadd.f32 1e-06, %v290_v30 }
 0x416   :  { %402 = vrcp.f32 %v292_v31 }
 0x41f   :  { %v401_v32 = vpop.eup %400 }
 0x420   :  { %v294_v34 = vmul.f32 %v401_v32, %v265_v10 }
 0x422   :  { %v303_v36 = vmul.f32 %v343_v33, %v294_v34 }
 0x423   :  { %v403_v37 = vpop.eup %402 }
 0x424   :  { %v296_v38 = vmul.f32 %v403_v37, %v266_v14  ;;  %v311_v39 = vadd.f32 %v344_v35, %v303_v36 }
 0x426   :  { %v304_v40 = vmul.f32 %v343_v33, %v296_v38  ;;  %313 = vst.msk [vmem:[#allocation2] sm:$0xff] %vm40_vm0, %v311_v39 }
 0x428   :  { %v312_v41 = vadd.f32 %v344_v35, %v304_v40 }
 0x42a   :  { %314 = vst.msk [vmem:[#allocation2 + $0x8] sm:$0xff] %vm40_vm0, %v312_v41 }
 0x42b   :  { %415 = shalt.err (!%p412_p4)
}
 0x42c   :  { %s429_s7 = smov 128   ;;  %s430_s8 = smov 8  }
 0x42d   :  { %326 = dma.vmem_to_hbm [thread:$0]  %s321_s29, 256, %s553_s9, [#allocation3], %s429_s7, %s429_s7, %s430_s8  }
 0x42e   :  { %424 = dma.done.wait [#allocation3], 256  }
 0x42f   :  { %425 = vsyncadd [#allocation3], 4294967040 }
 0x430   :  { %330 = vsyncpa [#allocation3], 1 }

// kernel: encoder.5
= control target key start
LH: loop header
LB: loop body
LE: loop exit
PB: predicated region body
PF: predicated region fallthrough
CT: control target
= control target key end

     0   :  { %vm33_vm0 = vcmask 261120   ;;  %v327_v15 = vmov 0.0   ;;  %vm328_vm1 = vmmov 0   ;;  %vm201_vm6 = vcmask 523264   ;;  %s423_s0 = inlined_call_operand.vmem [shape: bf16[16,32], index: 0, kind: input, shape index: {}]   ;;  %s424_s3 = inlined_call_operand.vmem [shape: bf16[32,64], index: 3, kind: input, shape index: {}]   ;;  %s425_s5 = inlined_call_operand.vmem [shape: bf16[64,32], index: 5, kind: input, shape index: {}]   ;;  %s426_s1 = inlined_call_operand.vmem [shape: f32[1,32], index: 1, kind: input, shape index: {}]   ;;  %s427_s2 = inlined_call_operand.vmem [shape: f32[1,32], index: 2, kind: input, shape index: {}]   ;;  %s428_s4 = inlined_call_operand.vmem [shape: f32[1,64], index: 4, kind: input, shape index: {}]   ;;  %s429_s6 = inlined_call_operand.vmem [shape: f32[1,32], index: 6, kind: input, shape index: {}]   ;;  %s430_s7 = inlined_call_operand.vmem [shape: bf16[16,32], index: 7, kind: output, shape index: {}]  }
   0x1   :  { %v280_v0 = vld [vmem:[%s423_s0] sm:$0xff]   ;;  %291 = vmatprep.subr.bf16.mxu0 %v327_v15  ;;  %v313_v16 = vld [vmem:[%s424_s3 + $0x8] sm:$0xff]   ;;  %295 = vmatprep.mubr.msk.bf16.mxu0 %vm328_vm1, %v327_v15  ;;  %v315_v18 = vld [vmem:[%s425_s5 + $0x18] sm:$0xff]   ;;  %vm256_vm7 = vcmask 257024  }
   0x2   :  { %v372_v1 = vunpack.c.l.bf16 %v280_v0  ;;  %v374_v2 = vunpack.c.h.bf16 %v280_v0  ;;  %299 = vmatprep.subr.bf16.mxu1 %v327_v15  ;;  %307 = vmatprep.mubr.msk.bf16.mxu1 %vm328_vm1, %v327_v15  ;;  %v314_v17 = vld [vmem:[%s424_s3] sm:$0xff]   ;;  %v316_v46 = vld [vmem:[%s425_s5 + $0x10] sm:$0xff]   ;;  %v317_v47 = vld [vmem:[%s425_s5 + $0x8] sm:$0xff]  }
   0x3   :  { %292 = vmatpush3.bf16.msra.mxu0 %v313_v16  ;;  %300 = vmatpush3.bf16.msra.mxu1 %v315_v18  ;;  %v263_v37 = vld [vmem:[%s426_s1] ss:$0 sm:$0xff] }
   0x4   :  { %v34_v3 = vsel %vm33_vm0, %v372_v1, 0.0  ;;  %v37_v4 = vsel %vm33_vm0, %v374_v2, 0.0  ;;  %293 = vmatprep.subr.bf16.mxu0 %v327_v15  ;;  %301 = vmatprep.subr.bf16.mxu1 %v327_v15  ;;  %v264_v41 = vld [vmem:[%s427_s2] ss:$0 sm:$0xff] }
   0x5   :  { %35 = vadd.xlane.f32.xlu0 %v34_v3  ;;  %v318_v48 = vld [vmem:[%s425_s5] sm:$0xff]  }
   0x6   :  { %v265_v49 = vld [vmem:[%s428_s4] ss:$0 sm:$0xff] }
   0x7   :  { %294 = vmatpush3.bf16.msra.mxu0 %v314_v17  ;;  %302 = vmatpush3.bf16.msra.mxu1 %v316_v46  ;;  %v269_v59 = vld [vmem:[%s429_s6] ss:$0 sm:$0xff] }
   0x8   :  { %303 = vmatprep.subr.bf16.mxu1 %v327_v15 }
   0x9   :  { %38 = vadd.xlane.f32.xlu0 %v37_v4 }
   0xb   :  { %304 = vmatpush3.bf16.msra.mxu1 %v317_v47 }
   0xc   :  { %305 = vmatprep.subr.bf16.mxu1 %v327_v15 }
   0xf   :  { %306 = vmatpush3.bf16.msra.mxu1 %v318_v48 }
  0x8e   :  { %v36_v5 = vpop.xlane.xlu0 %35 }
  0x8f   :  { %v41_v6 = vmul.f32 0.03125, %v36_v5 }
  0x91   :  { %v43_v7 = vsub.f32 %v372_v1, %v41_v6 }
  0x92   :  { %v39_v8 = vpop.xlane.xlu0 %38 }
  0x93   :  { %v42_v9 = vmul.f32 0.03125, %v39_v8  ;;  %v45_v10 = vmul.f32 %v43_v7, %v43_v7 }
  0x95   :  { %v44_v11 = vsub.f32 %v374_v2, %v42_v9  ;;  %v47_v12 = vsel %vm33_vm0, %v45_v10, 0.0 }
  0x96   :  { %48 = vadd.xlane.f32.xlu1 %v47_v12 }
  0x97   :  { %v46_v13 = vmul.f32 %v44_v11, %v44_v11 }
  0x99   :  { %v50_v14 = vsel %vm33_vm0, %v46_v13, 0.0 }
  0x9a   :  { %51 = vadd.xlane.f32.xlu1 %v50_v14 }
 0x11f   :  { %v49_v19 = vpop.xlane.xlu1 %48 }
 0x120   :  { %v53_v20 = vmul.f32 0.032258064, %v49_v19 }
 0x122   :  { %319 = vrsqrt.f32 %v53_v20  ;;  %vm57_vm2 = vcmp.eq.f32.partialorder %v53_v20, inf  ;;  %v60_v25 = vand.u32 2147483648, %v53_v20  ;;  %vm59_vm3 = vcmp.eq.f32.partialorder %v53_v20, 0.0 }
 0x123   :  { %v52_v21 = vpop.xlane.xlu1 %51 }
 0x124   :  { %v54_v22 = vmul.f32 0.032258064, %v52_v21 }
 0x126   :  { %321 = vrsqrt.f32 %v54_v22  ;;  %vm64_vm4 = vcmp.eq.f32.partialorder %v54_v22, inf  ;;  %v67_v31 = vand.u32 2147483648, %v54_v22  ;;  %vm66_vm5 = vcmp.eq.f32.partialorder %v54_v22, 0.0 }
 0x12f   :  { %v320_v23 = vpop.eup %319 }
 0x130   :  { %v56_v24 = vmul.f32 %v320_v23, %v53_v20 }
 0x132   :  { %v58_v26 = vsel %vm57_vm2, %v53_v20, %v56_v24 }
 0x133   :  { %v322_v27 = vpop.eup %321  ;;  %v61_v28 = vsel %vm59_vm3, %v60_v25, %v58_v26 }
 0x134   :  { %v69_v29 = vadd.f32 1e-06, %v61_v28  ;;  %v63_v30 = vmul.f32 %v322_v27, %v54_v22 }
 0x136   :  { %323 = vrcp.f32 %v69_v29  ;;  %v65_v32 = vsel %vm64_vm4, %v54_v22, %v63_v30 }
 0x137   :  { %v68_v33 = vsel %vm66_vm5, %v67_v31, %v65_v32 }
 0x138   :  { %v70_v34 = vadd.f32 1e-06, %v68_v33 }
 0x13a   :  { %325 = vrcp.f32 %v70_v34 }
 0x143   :  { %v324_v35 = vpop.eup %323 }
 0x144   :  { %v72_v36 = vmul.f32 %v324_v35, %v43_v7 }
 0x146   :  { %v81_v40 = vmul.f32 %v263_v37, %v72_v36 }
 0x147   :  { %v326_v38 = vpop.eup %325 }
 0x148   :  { %v74_v39 = vmul.f32 %v326_v38, %v44_v11  ;;  %v89_v43 = vadd.f32 %v264_v41, %v81_v40 }
 0x14a   :  { %v82_v42 = vmul.f32 %v263_v37, %v74_v39 }
 0x14c   :  { %v90_v44 = vadd.f32 %v264_v41, %v82_v42 }
 0x14e   :  { %v91_v45 = vpack.c.bf16 %v90_v44, %v89_v43 }
 0x150   :  { %296 = vmatmul.mubr.msk.bf16.vlgmr.msra.gmra.mxu0 %vm33_vm0, %v91_v45 }
 0x210   :  { %v152_v50 = vpop.f32.mrf.mxu0 }
 0x211   :  { %v153_v52 = vadd.f32 %v265_v49, %v152_v50 }
 0x212   :  { %v297_v51 = vpop.f32.mrf.mxu0 }
 0x213   :  { %v159_v56 = vmax.f32 %v153_v52, 0.0 }
 0x214   :  { %v155_v53 = vpop.f32.mrf.mxu0 }
 0x215   :  { %v156_v54 = vadd.f32 %v265_v49, %v155_v53 }
 0x216   :  { %v298_v55 = vpop.f32.mrf.mxu0 }
 0x217   :  { %v160_v57 = vmax.f32 %v156_v54, 0.0 }
 0x219   :  { %v161_v58 = vpack.c.bf16 %v160_v57, %v159_v56 }
 0x21b   :  { %308 = vmatmul.mubr.msk.bf16.vlgmr.msra.gmra.mxu1 %vm201_vm6, %v161_v58 }
 0x2db   :  { %v239_v60 = vpop.f32.mrf.mxu1 }
 0x2dc   :  { %v240_v61 = vadd.f32 %v269_v59, %v239_v60 }
 0x2dd   :  { %v309_v62 = vpop.f32.mrf.mxu1 }
 0x2de   :  { %v246_v63 = vadd.f32 %v372_v1, %v240_v61 }
 0x2df   :  { %v242_v0 = vpop.f32.mrf.mxu1 }
 0x2e0   :  { %v277_v3 = vpack.c.bf16 %v246_v63, %v246_v63  ;;  %v243_v4 = vadd.f32 %v269_v59, %v242_v0 }
 0x2e1   :  { %v310_v5 = vpop.f32.mrf.mxu1 }
 0x2e2   :  { %257 = vst.msk [vmem:[%s430_s7] sm:$0xf] %vm256_vm7, %v277_v3  ;;  %v247_v6 = vadd.f32 %v374_v2, %v243_v4 }
 0x2e4   :  { %v278_v7 = vpack.c.bf16 %v247_v6, %v247_v6 }
 0x2e6   :  { %258 = vst.msk [vmem:[%s430_s7 + $0x4] sm:$0xf] %vm256_vm7, %v278_v7 }

// kernel: encoder.4
= control target key start
LH: loop header
LB: loop body
LE: loop exit
PB: predicated region body
PF: predicated region fallthrough
CT: control target
= control target key end

     0   :  { %s1573_s17 = smov 0   ;;  %s1575_s18 = smov 0   ;;  %s1735_s0 = inlined_call_operand.vmem [shape: bf16[2,8,32], index: 0, kind: input, shape index: {}]   ;;  %s1736_s1 = inlined_call_operand.vmem [shape: bf16[2,16,32], index: 1, kind: input, shape index: {}]   ;;  %s1737_s2 = inlined_call_operand.vmem [shape: s8[2,8,16], index: 2, kind: input, shape index: {}]   ;;  %s1738_s3 = inlined_call_operand.vmem [shape: f32[1,32], index: 3, kind: input, shape index: {}]   ;;  %s1739_s4 = inlined_call_operand.vmem [shape: f32[1,32], index: 4, kind: input, shape index: {}]   ;;  %s1740_s5 = inlined_call_operand.vmem [shape: bf16[32,32], index: 5, kind: input, shape index: {}]   ;;  %s1741_s6 = inlined_call_operand.vmem [shape: f32[1,32], index: 6, kind: input, shape index: {}]   ;;  %s1742_s7 = inlined_call_operand.vmem [shape: bf16[32,64], index: 7, kind: input, shape index: {}]   ;;  %s1743_s8 = inlined_call_operand.vmem [shape: f32[1,64], index: 8, kind: input, shape index: {}]   ;;  %s1744_s9 = inlined_call_operand.vmem [shape: bf16[32,32], index: 9, kind: input, shape index: {}]   ;;  %s1745_s10 = inlined_call_operand.vmem [shape: f32[1,32], index: 10, kind: input, shape index: {}]   ;;  %s1746_s11 = inlined_call_operand.vmem [shape: bf16[2,8,32], index: 11, kind: output, shape index: {}]  }
   0x1   :  { %s1577_s19 = smov 0  }
   0x2 LB: > { %s33_s20 = sadd.s32 1, %s1495_s18  ;;  %p1285_p0 = scmp.ge.s32.totalorder %s1499_s19, 1  ;;  %s1499_s19 = sphi %s1577_s19, %s21_s19   ;;  %s1495_s18 = sphi %s1575_s18, %s1748_s18   ;;  %s1491_s17 = sphi %s1573_s17, %s1747_s17  }
   0x3   : > { %p35_p1 = scmp.ge.s32.totalorder %s33_s20, 2  ;;  %p379_p2 = scmp.lt.s32.totalorder %s1499_s19, 3 }
   0x5   : > { %s1750_s20 = smov (%p35_p1, %s33_s20), 0  ;;  %p380_p3 = pnand %p1285_p0, %p379_p2 }
   0x6   : > { %p435_p4 = scmp.lt.s32.totalorder (!%p380_p3), %s1491_s17, 1  ;;  %s1504_s30 = smov (!%p380_p3), 112  }
   0x7   : > { %383 = sbr.rel (%p380_p3) target bundleno = 1549 (0x60d), region = 64  ;;  %s1505_s14 = smov (!%p380_p3), 104  }
   0x8   : > { %s1507_s25 = smov (!%p380_p3), 96   ;;  %s1508_s26 = smov (!%p380_p3), 72  }
   0x9   : > { %s1509_s27 = smov (!%p380_p3), 80   ;;  %s1510_s28 = smov (!%p380_p3), 8  }
   0xc   : > { %s1752_s17 = smov (!%p435_p4, %s1491_s17), 1  ;;  %vm468_vm0 = vcmask 261120   ;;  %v1450_v8 = vld [vmem:[%s1742_s7 + $0x8] sm:$0xff]   ;;  %v1501_v9 = vmov 0.0   ;;  %v1451_v10 = vld [vmem:[%s1742_s7] sm:$0xff]   ;;  %vm1502_vm1 = vmmov 0  }
   0xd   : > { %s1286_s21 = sshll.u32 %s1752_s17, 2  ;;  %1350 = vmatprep.subr.bf16.mxu1 %v1501_v9  ;;  %1342 = vmatprep.subr.bf16.mxu0 %v1501_v9  ;;  %s1316_s29 = sshll.u32 %s1752_s17, 3  ;;  %v1453_v11 = vld [vmem:[%s1740_s5 + $0x8] sm:$0xff]   ;;  %v1454_v12 = vld [vmem:[%s1740_s5] sm:$0xff]   ;;  %vm649_vm4 = vcmask 64512   ;;  %vm698_vm6 = vcmask 130048  }
   0xe   : > { %s441_s24 = scalar_lea.vmem %s1735_s0, %s1286_s21  ;;  %1351 = vmatpush3.bf16.msra.mxu1 %v1450_v8  ;;  %1354 = vmatprep.mubr.msk.bf16.mxu1 %vm1502_vm1, %v1501_v9  ;;  %s446_s15 = scalar_lea.vmem %s1736_s1, %s1316_s29  ;;  %v1291_v23 = vld [vmem:[%s1738_s3] ss:$0 sm:$0xff]  ;;  %vm874_vm7 = vcmask 130112   ;;  %vm990_vm8 = vcmask 195712   ;;  %vm1106_vm9 = vcmask 261312   ;;  %vm1178_vm10 = vcmask 257024  }
   0xf   : > { %v462_v0 = vld [vmem:[%s441_s24] sm:$0xf]  ;;  %1352 = vmatprep.subr.bf16.mxu1 %v1501_v9  ;;  %1343 = vmatpush3.bf16.msra.mxu0 %v1453_v11  ;;  %s1503_s29 = smov 120   ;;  %s1506_s24 = smov 88  }
  0x10   : > { %v1599_v1 = vunpack.c.l.bf16 %v462_v0  ;;  %v1452_v13 = vld [vmem:[%s446_s15] sm:$0xff]   ;;  %1346 = vmatprep.mubr.msk.bf16.mxu0 %vm1502_vm1, %v1501_v9  ;;  %1344 = vmatprep.subr.bf16.mxu0 %v1501_v9  ;;  %s1289_s15 = sshll.u32 %s1752_s17, 1 }
  0x11   : > { %v1292_v25 = vld [vmem:[%s1739_s4] ss:$0 sm:$0xff]  ;;  %s453_s23 = scalar_lea.vmem %s1737_s2, %s1289_s15  ;;  %s1512_s15 = smov 24  }
  0x12   : > { %v469_v2 = vsel %vm468_vm0, %v1599_v1, 0.0  ;;  %1353 = vmatpush3.bf16.msra.mxu1 %v1451_v10  ;;  %v1297_v29 = vld [vmem:[%s1743_s8] ss:$0 sm:$0xff] }
  0x13   : > { %470 = vadd.xlane.f32.xlu0 %v469_v2  ;;  %1364 = vmatprep.subr.bf16.mxu1 %v1501_v9  ;;  %v1293_v38 = vld [vmem:[%s1741_s6] ss:$0 sm:$0xff] }
  0x14   : > { %1345 = vmatpush3.bf16.msra.mxu0 %v1454_v12  ;;  %v645_v54 = vld [vmem:[%s453_s23] sm:$0x3] }
  0x15   : > { %1355 = vmatmul.mubr.msk.bf16.vlgmr.msra.gmra.mxu1 %vm468_vm0, %v1452_v13  ;;  %1358 = vmatprep.subr.bf16.mxu0 %v1501_v9  ;;  %v646_v55 = vunpack.c.0.s8 %v645_v54 }
  0x16   : > { %1366 = vmatprep.mubr.msk.bf16.mxu1 %vm1502_vm1, %v1501_v9 }
  0x17   : > { %v647_v56 = vcvt.s32.f32 %v646_v55 }
  0x19   : > { %vm648_vm5 = vcmp.gt.f32.partialorder %v647_v56, 0.0 }
  0x9c   : > { %v471_v3 = vpop.xlane.xlu0 %470 }
  0x9d   : > { %v473_v4 = vmul.f32 0.03125, %v471_v3 }
  0x9f   : > { %v474_v5 = vsub.f32 %v1599_v1, %v473_v4 }
  0xa1   : > { %v475_v6 = vmul.f32 %v474_v5, %v474_v5 }
  0xa3   : > { %v476_v7 = vsel %vm468_vm0, %v475_v6, 0.0 }
  0xa4   : > { %477 = vadd.xlane.f32.xlu0 %v476_v7 }
  0xd5   : > { %v636_v30 = vpop.f32.mrf.mxu1 }
  0xd6   : > { %v637_v32 = vadd.f32 %v1297_v29, %v636_v30 }
  0xd7   : > { %v1356_v31 = vpop.f32.mrf.mxu1 }
  0xd9   : > { %v639_v33 = vpop.f32.mrf.mxu1 }
  0xda   : > { %v640_v34 = vadd.f32 %v1297_v29, %v639_v33 }
  0xdb   : > { %v1357_v35 = vpop.f32.mrf.mxu1 }
  0xdc   : > { %v1646_v36 = vpack.c.bf16 %v640_v34, %v637_v32 }
  0xde   : > { %762 = vrot.lane.b32.xlu1 %v1646_v36, %s1503_s29  ;;  %878 = vrot.lane.b32.xlu0 %v1646_v36, %s1504_s30  ;;  %v654_v37 = vsel %vm649_vm4, %v1646_v36, 0 }
 0x12d   : > { %v478_v14 = vpop.xlane.xlu0 %477 }
 0x12e   : > { %v479_v15 = vmul.f32 0.032258064, %v478_v14 }
 0x130   : > { %1457 = vrsqrt.f32 %v479_v15  ;;  %vm482_vm2 = vcmp.eq.f32.partialorder %v479_v15, inf  ;;  %v485_v18 = vand.u32 2147483648, %v479_v15  ;;  %vm484_vm3 = vcmp.eq.f32.partialorder %v479_v15, 0.0 }
 0x13d   : > { %v1458_v16 = vpop.eup %1457 }
 0x13e   : > { %v481_v17 = vmul.f32 %v1458_v16, %v479_v15 }
 0x140   : > { %v483_v19 = vsel %vm482_vm2, %v479_v15, %v481_v17 }
 0x141   : > { %v486_v20 = vsel %vm484_vm3, %v485_v18, %v483_v19 }
 0x142   : > { %v487_v21 = vadd.f32 1e-06, %v486_v20 }
 0x144   : > { %1459 = vrcp.f32 %v487_v21 }
 0x150   : > { %v763_v40 = vpop.permute.xlu1 %762  ;;  %v879_v47 = vpop.permute.xlu0 %878 }
 0x151   : > { %v1460_v22 = vpop.eup %1459  ;;  %v768_v44 = vsel %vm649_vm4, %v763_v40, 0  ;;  %v884_v49 = vsel %vm649_vm4, %v879_v47, 0 }
 0x152   : > { %v489_v24 = vmul.f32 %v1460_v22, %v474_v5 }
 0x154   : > { %v496_v26 = vmul.f32 %v1291_v23, %v489_v24 }
 0x156   : > { %v503_v27 = vadd.f32 %v1292_v25, %v496_v26 }
 0x158   : > { %v504_v28 = vpack.c.bf16 %v503_v27, %v503_v27 }
 0x15a   : > { %1347 = vmatmul.mubr.msk.bf16.vlgmr.msra.gmra.mxu0 %vm468_vm0, %v504_v28 }
 0x15b   : > { %1360 = vmatprep.mubr.msk.bf16.mxu0 %vm1502_vm1, %v1501_v9  ;;  %1359 = vmatpush3.bf16.xpose.msra.mxu0 %v654_v37 }
 0x15c   : > { %1370 = vmatprep.subr.bf16.mxu0 %v1501_v9 }
 0x21a   : > { %v565_v39 = vpop.f32.mrf.mxu0 }
 0x21b   : > { %v566_v41 = vadd.f32 %v1293_v38, %v565_v39 }
 0x21c   : > { %v1348_v42 = vpop.f32.mrf.mxu0 }
 0x21d   : > { %v643_v43 = vpack.c.bf16 %v566_v41, %v566_v41 }
 0x21e   : > { %v568_v45 = vpop.f32.mrf.mxu0 }
 0x21f   : > { %760 = vrot.lane.b32.xlu1 %v643_v43, %s1503_s29  ;;  %1361 = vmatmul.mubr.msk.bf16.vlgmr.msra.gmra.mxu0 %vm649_vm4, %v643_v43 }
 0x220   : > { %v1349_v46 = vpop.f32.mrf.mxu0  ;;  %1371 = vmatpush3.bf16.xpose.msra.mxu0 %v768_v44  ;;  %1372 = vmatprep.mubr.msk.bf16.mxu0 %vm1502_vm1, %v1501_v9 }
 0x221   : > { %1382 = vmatprep.subr.bf16.mxu0 %v1501_v9 }
 0x223   : > { %876 = vrot.lane.b32.xlu1 %v643_v43, %s1504_s30 }
 0x227   : > { %994 = vrot.lane.b32.xlu1 %v1646_v36, %s1505_s14 }
 0x22b   : > { %992 = vrot.lane.b32.xlu1 %v643_v43, %s1505_s14  ;;  %s1511_s14 = smov 16  }
 0x291   : > { %v761_v48 = vpop.permute.xlu1 %760 }
 0x292   : > { %1373 = vmatmul.mubr.msk.bf16.vlgmr.msra.gmra.mxu0 %vm649_vm4, %v761_v48 }
 0x293   : > { %1383 = vmatpush3.bf16.xpose.msra.mxu0 %v884_v49  ;;  %1384 = vmatprep.mubr.msk.bf16.mxu0 %vm1502_vm1, %v1501_v9 }
 0x294   : > { %1394 = vmatprep.subr.bf16.mxu0 %v1501_v9 }
 0x295   : > { %v877_v50 = vpop.permute.xlu1 %876 }
 0x299   : > { %v995_v51 = vpop.permute.xlu1 %994 }
 0x29a   : > { %v1000_v52 = vsel %vm649_vm4, %v995_v51, 0  ;;  %1385 = vmatmul.mubr.msk.bf16.vlgmr.msra.gmra.mxu0 %vm649_vm4, %v877_v50 }
 0x29b   : > { %1395 = vmatpush3.bf16.xpose.msra.mxu0 %v1000_v52  ;;  %1396 = vmatprep.mubr.msk.bf16.mxu0 %vm1502_vm1, %v1501_v9 }
 0x29c   : > { %1406 = vmatprep.subr.bf16.mxu0 %v1501_v9 }
 0x29d   : > { %v993_v53 = vpop.permute.xlu1 %992 }
 0x2a2   : > { %1397 = vmatmul.mubr.msk.bf16.vlgmr.msra.gmra.mxu0 %vm649_vm4, %v993_v53 }
 0x2a3   : > { %1410 = vmatprep.mubr.msk.bf16.mxu0 %vm1502_vm1, %v1501_v9 }
 0x2df   : > { %v690_v57 = vpop.f32.mrf.mxu0 }
 0x2e0   : > { %v696_v58 = vmul.f32 0.35355338, %v690_v57 }
 0x2e1   : > { %v1362_v59 = vpop.f32.mrf.mxu0 }
 0x2e2   : > { %v697_v60 = vsel %vm648_vm5, %v696_v58, -1e+09 }
 0x2e3   : > { %v693_v61 = vpop.f32.mrf.mxu0  ;;  %v699_v62 = vsel %vm698_vm6, %v697_v60, -inf }
 0x2e4   : > { %700 = vmax.xlane.f32.xlu1 %v699_v62 }
 0x2e5   : > { %v1363_v63 = vpop.f32.mrf.mxu0 }
 0x2f5   : > { %822 = vrot.lane.b32.xlu1 %v1646_v36, %s1506_s24 }
 0x352   : > { %v804_v0 = vpop.f32.mrf.mxu0 }
 0x353   : > { %v810_v2 = vmul.f32 0.35355338, %v804_v0 }
 0x354   : > { %v1374_v3 = vpop.f32.mrf.mxu0 }
 0x355   : > { %v811_v4 = vsel %vm648_vm5, %v810_v2, -1e+09 }
 0x356   : > { %v807_v5 = vpop.f32.mrf.mxu0  ;;  %v812_v6 = vsel %vm698_vm6, %v811_v4, -inf }
 0x357   : > { %813 = vmax.xlane.f32.xlu0 %v812_v6 }
 0x358   : > { %v1375_v7 = vpop.f32.mrf.mxu0 }
 0x359   : > { %v1456_v7 = vld [vmem:[%s1744_s9] sm:$0xff]  }
 0x35a   : > { %v920_v8 = vpop.f32.mrf.mxu0 }
 0x35b   : > { %v926_v10 = vmul.f32 0.35355338, %v920_v8 }
 0x35c   : > { %v1386_v11 = vpop.f32.mrf.mxu0 }
 0x35d   : > { %v927_v12 = vsel %vm648_vm5, %v926_v10, -1e+09 }
 0x35e   : > { %v923_v13 = vpop.f32.mrf.mxu0  ;;  %v928_v14 = vsel %vm698_vm6, %v927_v12, -inf }
 0x35f   : > { %929 = vmax.xlane.f32.xlu1 %v928_v14 }
 0x360   : > { %v1387_v15 = vpop.f32.mrf.mxu0 }
 0x362   : > { %v1036_v16 = vpop.f32.mrf.mxu0 }
 0x363   : > { %v1042_v17 = vmul.f32 0.35355338, %v1036_v16 }
 0x364   : > { %v1398_v18 = vpop.f32.mrf.mxu0 }
 0x365   : > { %v1043_v19 = vsel %vm648_vm5, %v1042_v17, -1e+09 }
 0x366   : > { %v1039_v20 = vpop.f32.mrf.mxu0  ;;  %v1044_v21 = vsel %vm698_vm6, %v1043_v19, -inf }
 0x367   : > { %1045 = vmax.xlane.f32.xlu1 %v1044_v21 }
 0x368   : > { %v1399_v22 = vpop.f32.mrf.mxu0 }
 0x36d   : > { %710 = vrot.lane.b32.xlu0 %v1646_v36, %s1507_s25  ;;  %v701_v23 = vpop.xlane.xlu1 %700  ;;  %s460_s25 = scalar_lea.vmem %s1746_s11, %s1286_s21 }
 0x36e   : > { %v702_v24 = vsub.f32 %v697_v60, %v701_v23  ;;  %v1310_v23 = vld [vmem:[%s1745_s10] ss:$0 sm:$0xff] }
 0x370   : > { %v703_v25 = vmul.f32 1.442695, %v702_v24 }
 0x371   : > { %1054 = vrot.lane.b32.xlu0 %v1646_v36, %s1508_s26  ;;  %v823_v30 = vpop.permute.xlu1 %822 }
 0x372   : > { %1461 = vpow2.f32 %v703_v25 }
 0x378   : > { %938 = vrot.lane.b32.xlu1 %v1646_v36, %s1509_s27 }
 0x37f   : > { %v1462_v28 = vpop.eup %1461 }
 0x380   : > { %v708_v32 = vpack.c.bf16 %v1462_v28, %v1462_v28  ;;  %v705_v43 = vsel %vm698_vm6, %v1462_v28, 0.0 }
 0x3e0   : > { %v814_v26 = vpop.xlane.xlu0 %813 }
 0x3e1   : > { %v815_v27 = vsub.f32 %v811_v4, %v814_v26  ;;  %v1455_v4 = vld [vmem:[%s1744_s9 + $0x8] sm:$0xff]  }
 0x3e2   : > { %1407 = vmatpush3.bf16.msra.mxu0 %v1455_v4 }
 0x3e3   : > { %v816_v29 = vmul.f32 1.442695, %v815_v27  ;;  %1408 = vmatprep.subr.bf16.mxu0 %v1501_v9 }
 0x3e4   : > { %v711_v31 = vpop.permute.xlu0 %710 }
 0x3e5   : > { %1463 = vpow2.f32 %v816_v29  ;;  %1365 = vmatpush3.bf16.msra.mxu1 %v711_v31 }
 0x3e6   : > { %1376 = vmatprep.subr.bf16.mxu1 %v1501_v9  ;;  %1409 = vmatpush3.bf16.msra.mxu0 %v1456_v7 }
 0x3e8   : > { %v930_v33 = vpop.xlane.xlu1 %929  ;;  %1367 = vmatmul.mubr.msk.bf16.vlgmr.msra.gmra.mxu1 %vm698_vm6, %v708_v32  ;;  %v1055_v47 = vpop.permute.xlu0 %1054 }
 0x3e9   : > { %v931_v34 = vsub.f32 %v927_v12, %v930_v33  ;;  %1377 = vmatpush3.bf16.msra.mxu1 %v823_v30  ;;  %1378 = vmatprep.mubr.msk.bf16.mxu1 %vm1502_vm1, %v1501_v9 }
 0x3ea   : > { %1388 = vmatprep.subr.bf16.mxu1 %v1501_v9 }
 0x3eb   : > { %v932_v35 = vmul.f32 1.442695, %v931_v34 }
 0x3ed   : > { %1465 = vpow2.f32 %v932_v35 }
 0x3f0   : > { %v1046_v36 = vpop.xlane.xlu1 %1045 }
 0x3f1   : > { %v1047_v37 = vsub.f32 %v1043_v19, %v1046_v36 }
 0x3f2   : > { %v1464_v38 = vpop.eup %1463 }
 0x3f3   : > { %v1048_v39 = vmul.f32 1.442695, %v1047_v37  ;;  %v818_v40 = vsel %vm698_vm6, %v1464_v38, 0.0  ;;  %v821_v41 = vpack.c.bf16 %v1464_v38, %v1464_v38 }
 0x3f4   : > { %v939_v42 = vpop.permute.xlu1 %938  ;;  %819 = vadd.xlane.f32.xlu1 %v818_v40 }
 0x3f5   : > { %1467 = vpow2.f32 %v1048_v39  ;;  %1379 = vmatmul.mubr.msk.bf16.vlgmr.msra.gmra.mxu1 %vm698_vm6, %v821_v41 }
 0x3f6   : > { %1389 = vmatpush3.bf16.msra.mxu1 %v939_v42  ;;  %1390 = vmatprep.mubr.msk.bf16.mxu1 %vm1502_vm1, %v1501_v9 }
 0x3f7   : > { %1400 = vmatprep.subr.bf16.mxu1 %v1501_v9 }
 0x3f8   : > { %706 = vadd.xlane.f32.xlu1 %v705_v43 }
 0x3fa   : > { %v1466_v44 = vpop.eup %1465 }
 0x3fb   : > { %v934_v45 = vsel %vm698_vm6, %v1466_v44, 0.0  ;;  %v937_v46 = vpack.c.bf16 %v1466_v44, %v1466_v44 }
 0x3fc   : > { %935 = vadd.xlane.f32.xlu0 %v934_v45 }
 0x3fd   : > { %1391 = vmatmul.mubr.msk.bf16.vlgmr.msra.gmra.mxu1 %vm698_vm6, %v937_v46 }
 0x3fe   : > { %1401 = vmatpush3.bf16.msra.mxu1 %v1055_v47  ;;  %1402 = vmatprep.mubr.msk.bf16.mxu1 %vm1502_vm1, %v1501_v9 }
 0x402   : > { %v1468_v48 = vpop.eup %1467 }
 0x403   : > { %v1050_v49 = vsel %vm698_vm6, %v1468_v48, 0.0  ;;  %v1053_v50 = vpack.c.bf16 %v1468_v48, %v1468_v48 }
 0x404   : > { %1051 = vadd.xlane.f32.xlu0 %v1050_v49 }
 0x405   : > { %1403 = vmatmul.mubr.msk.bf16.vlgmr.msra.gmra.mxu1 %vm698_vm6, %v1053_v50 }
 0x47d   : > { %v820_v51 = vpop.xlane.xlu1 %819 }
 0x481   : > { %v707_v52 = vpop.xlane.xlu1 %706 }
 0x482   : > { %1469 = vrcp.f32 %v707_v52 }
 0x483   : > { %1471 = vrcp.f32 %v820_v51 }
 0x485   : > { %v936_v58 = vpop.xlane.xlu0 %935 }
 0x486   : > { %1473 = vrcp.f32 %v936_v58 }
 0x48d   : > { %v1052_v61 = vpop.xlane.xlu0 %1051 }
 0x48e   : > { %1475 = vrcp.f32 %v1052_v61 }
 0x48f   : > { %v1470_v53 = vpop.eup %1469 }
 0x490   : > { %v1472_v60 = vpop.eup %1471 }
 0x493   : > { %v1474_v5 = vpop.eup %1473 }
 0x49b   : > { %v1476_v13 = vpop.eup %1475 }
 0x4a8   : > { %v750_v54 = vpop.f32.mrf.mxu1 }
 0x4a9   : > { %v757_v55 = vmul.f32 %v1470_v53, %v750_v54 }
 0x4aa   : > { %v1368_v56 = vpop.f32.mrf.mxu1 }
 0x4ab   : > { %758 = vst.msk [vmem:[#allocation2] sm:$0xff] %vm649_vm4, %v757_v55 }
 0x4ac   : > { %v753_v57 = vpop.f32.mrf.mxu1 }
 0x4ae   : > { %v1369_v59 = vpop.f32.mrf.mxu1 }
 0x4b5   : > { %v862_v62 = vpop.f32.mrf.mxu1 }
 0x4b6   : > { %v869_v63 = vmul.f32 %v1472_v60, %v862_v62 }
 0x4b7   : > { %v1380_v0 = vpop.f32.mrf.mxu1 }
 0x4b8   : > { %871 = vrot.lane.b32.xlu0 %v869_v63, %s1510_s28 }
 0x4b9   : > { %v865_v2 = vpop.f32.mrf.mxu1 }
 0x4bb   : > { %v1381_v3 = vpop.f32.mrf.mxu1 }
 0x4bd   : > { %v978_v6 = vpop.f32.mrf.mxu1 }
 0x4be   : > { %v985_v8 = vmul.f32 %v1474_v5, %v978_v6 }
 0x4bf   : > { %v1392_v10 = vpop.f32.mrf.mxu1 }
 0x4c0   : > { %987 = vrot.lane.b32.xlu1 %v985_v8, %s1511_s14 }
 0x4c1   : > { %v981_v11 = vpop.f32.mrf.mxu1 }
 0x4c3   : > { %v1393_v12 = vpop.f32.mrf.mxu1 }
 0x4c5   : > { %v1094_v14 = vpop.f32.mrf.mxu1 }
 0x4c6   : > { %v1101_v15 = vmul.f32 %v1476_v13, %v1094_v14 }
 0x4c7   : > { %v1404_v16 = vpop.f32.mrf.mxu1 }
 0x4c8   : > { %1103 = vrot.lane.b32.xlu1 %v1101_v15, %s1512_s15 }
 0x4c9   : > { %v1097_v17 = vpop.f32.mrf.mxu1 }
 0x4cb   : > { %v1405_v18 = vpop.f32.mrf.mxu1 }
 0x52a   : > { %v872_v19 = vpop.permute.xlu0 %871 }
 0x52b   : > { %875 = vst.msk [vmem:[#allocation2] sm:$0xff] %vm874_vm7, %v872_v19 }
 0x532   : > { %v988_v9 = vpop.permute.xlu1 %987 }
 0x533   : > { %991 = vst.msk [vmem:[#allocation2] sm:$0xff] %vm990_vm8, %v988_v9 }
 0x53a   : > { %v1104_v20 = vpop.permute.xlu1 %1103 }
 0x53b   : > { %1107 = vst.msk [vmem:[#allocation2] sm:$0xff] %vm1106_vm9, %v1104_v20 }
 0x542   : > { %v1108_v21 = vld [vmem:[#allocation2] sm:$0xff] }
 0x543   : > { %v1109_v22 = vpack.c.bf16 %v1108_v21, %v1108_v21 }
 0x545   : > { %1411 = vmatmul.mubr.msk.bf16.vlgmr.msra.gmra.mxu0 %vm468_vm0, %v1109_v22 }
 0x605   : > { %v1170_v24 = vpop.f32.mrf.mxu0 }
 0x606   : > { %v1171_v25 = vadd.f32 %v1310_v23, %v1170_v24 }
 0x607   : > { %v1412_v26 = vpop.f32.mrf.mxu0 }
 0x608   : > { %v1176_v27 = vadd.f32 %v1171_v25, %v1599_v1 }
 0x609   : > { %v1173_v28 = vpop.f32.mrf.mxu0 }
 0x60a   : > { %v1177_v29 = vpack.c.bf16 %v1176_v27, %v1176_v27 }
 0x60b   : > { %v1413_v30 = vpop.f32.mrf.mxu0 }
 0x60c   : > { %1179 = vst.msk [vmem:[%s460_s25] sm:$0xf] %vm1178_vm10, %v1177_v29 }
 0x60d PF: > { %s21_s19 = sadd.s32 1, %s1499_s19   ;;  %s1747_s17 = smov %s1495_s18 }
 0x60e   : > { %p18_p5 = scmp.ge.s32.totalorder %s21_s19, 4   ;;  %s1748_s18 = smov %s1750_s20 }
 0x610   :  { %20 = sbr.rel (!%p18_p5) target bundleno = 2 (0x2), region = 100 }

</bundles_post_ra>
